<compile_context>
chip_gen: v7x
topology: tpu7x:2x2x1
jax: 0.10.0
libtpu: 0.0.40
codegen_flags: <defaults>
</compile_context>

<pallas_src>
import jax
import jax.numpy as jnp
from jax.experimental import pallas as pl
from jax.experimental.pallas import tpu as pltpu

K_IN = 28 * 28      # 784 flattened input features (full-dim block -> legal)
H = 128             # hidden size
N_CLASSES = 10
N_PAD = 128         # lane-dense padded output width


def _round_up(x, m):
    return ((x + m - 1) // m) * m


def mlp_kernel(x_ref,
               w1_ref, b1_ref,
               w2_ref, b2_ref,
               w3_ref, b3_ref,
               w4_ref, b4_ref,
               o_ref):
    # In-kernel bf16 cast of the f32 x tile (hidden under the x DMA).
    x = x_ref[...].astype(jnp.bfloat16)
    # Layer 1: bf16 x bf16 -> f32 accumulate, bias+ReLU in f32, back to bf16.
    h = jnp.dot(x, w1_ref[...],
                preferred_element_type=jnp.float32) + b1_ref[...]
    h = jnp.maximum(h, 0.0).astype(jnp.bfloat16)          # encoder ReLU
    # Layer 2 (encoder output) + classifier's leading ReLU.
    h = jnp.dot(h, w2_ref[...],
                preferred_element_type=jnp.float32) + b2_ref[...]
    h = jnp.maximum(h, 0.0).astype(jnp.bfloat16)
    # Layer 3.
    h = jnp.dot(h, w3_ref[...],
                preferred_element_type=jnp.float32) + b3_ref[...]
    h = jnp.maximum(h, 0.0).astype(jnp.bfloat16)
    # Layer 4: lane-dense 128-wide bf16 output (logits in the first 10 lanes).
    o_ref[...] = (jnp.dot(h, w4_ref[...],
                          preferred_element_type=jnp.float32)
                  + b4_ref[...]).astype(o_ref.dtype)


def prepare_params(params):
    """Pad + cast f32 [in,out] params into kernel layout (bf16 W, f32 b)."""
    (w1, b1), (w2, b2), (w3, b3), (w4, b4) = params
    w4p = jnp.zeros((H, N_PAD), jnp.float32).at[:, :N_CLASSES].set(w4)
    b4p = jnp.zeros((1, N_PAD), jnp.float32).at[:, :N_CLASSES].set(b4)
    return (w1.astype(jnp.bfloat16), b1.astype(jnp.float32),
            w2.astype(jnp.bfloat16), b2.astype(jnp.float32),
            w3.astype(jnp.bfloat16), b3.astype(jnp.float32),
            w4p.astype(jnp.bfloat16), b4p)


def mlp_forward(x_nchw, kernel_params, *, tb=1024):
    """x_nchw: [B, 1, 28, 28] float32 -> logits [B, 10] float32."""
    b = x_nchw.shape[0]
    # Batch tile: MXU-row aligned, capped to the (padded) batch for small runs.
    # v5e: tb=512-1024 is plenty; v6e: tb=1024; v7x can go to 2048 if the batch
    # still leaves >=4-8 grid steps per TensorCore.
    tb = min(tb, _round_up(b, 128))
    b_pad = _round_up(b, tb)
    grid = (b_pad // tb,)

    # Flatten (matches nn.Flatten on NCHW); keep f32 and the native 784 K dim —
    # no wrapper-side cast/K-pad materialization (cast happens in-kernel).
    x = x_nchw.reshape(b, -1)
    if b_pad != b:
        x = jnp.pad(x, ((0, b_pad - b), (0, 0)))

    (w1, b1, w2, b2, w3, b3, w4, b4) = kernel_params

    x_spec = pl.BlockSpec((tb, K_IN), lambda i: (i, 0))
    out_spec = pl.BlockSpec((tb, N_PAD), lambda i: (i, 0))
    const = lambda shape: pl.BlockSpec(shape, lambda i: (0, 0))  # VMEM-resident

    flops = 2 * b_pad * (K_IN * H + H * H + H * H + H * N_PAD)
    bytes_accessed = (
        b_pad * K_IN * 4 + b_pad * N_PAD * 2                       # f32 x in, bf16 logits out
        + (K_IN * H + 2 * H * H + H * N_PAD) * 2                   # bf16 weights
        + 4 * N_PAD * 4                                            # f32 biases
    )

    out = pl.pallas_call(
        mlp_kernel,
        out_shape=jax.ShapeDtypeStruct((b_pad, N_PAD), jnp.bfloat16),
        grid=grid,
        in_specs=[
            x_spec,
            const(w1.shape), const(b1.shape),
            const(w2.shape), const(b2.shape),
            const(w3.shape), const(b3.shape),
            const(w4.shape), const(b4.shape),
        ],
        out_specs=out_spec,
        compiler_params=pltpu.CompilerParams(
            dimension_semantics=("parallel",),
            vmem_limit_bytes=32 << 20,
        ),
        cost_estimate=pl.CostEstimate(
            flops=flops, transcendentals=0, bytes_accessed=bytes_accessed),
    )(x, w1, b1, w2, b2, w3, b3, w4, b4)

    # Slice off padded rows / lanes and upcast for downstream consumers.
    return out[:b, :N_CLASSES].astype(jnp.float32)


def init_params(key):
    """Deterministic init mimicking PyTorch nn.Linear default
    (U[-1/sqrt(in), 1/sqrt(in)]). Weights stored as [in, out]."""
    dims = [(K_IN, H), (H, H), (H, H), (H, N_CLASSES)]
    params = []
    for fan_in, fan_out in dims:
        key, kw, kb = jax.random.split(key, 3)
        bound = 1.0 / jnp.sqrt(fan_in)
        w = jax.random.uniform(kw, (fan_in, fan_out), jnp.float32, -bound, bound)
        b = jax.random.uniform(kb, (1, fan_out), jnp.float32, -bound, bound)
        params.append((w, b))
    return params


def reference_forward(x_nchw, params):
    x = x_nchw.reshape(x_nchw.shape[0], -1)
    (w1, b1), (w2, b2), (w3, b3), (w4, b4) = params
    h = jnp.maximum(x @ w1 + b1, 0.0)
    h = jnp.maximum(h @ w2 + b2, 0.0)
    h = jnp.maximum(h @ w3 + b3, 0.0)
    return h @ w4 + b4


if __name__ == "__main__":
    key = jax.random.PRNGKey(0)
    key, kx = jax.random.split(key)
    batch = 8
    x = jax.random.normal(kx, (batch, 1, 28, 28), jnp.float32)  # NCHW mnist-like
    params = init_params(key)
    kparams = prepare_params(params)

    logits = mlp_forward(x, kparams)
    logits = jax.block_until_ready(logits)

    ref = reference_forward(x, params)
    assert logits.shape == (batch, N_CLASSES)
    # bf16 activations/weights/logits with f32 accumulation -> loosened
    # tolerance vs the pure-f32 reference.
    assert jnp.allclose(logits, ref, atol=5e-2, rtol=5e-2), (
        float(jnp.max(jnp.abs(logits - ref))))
    print("KERNEL_OK")
</pallas_src>

<mosaic_0001>
module attributes {stable_mosaic.version = 11 : i64} {
  func.func @mlp_kernel(%arg0: i32, %arg1: memref<128x784xf32, #tpu.memory_space<vmem>>, %arg2: memref<784x128xbf16, #tpu.memory_space<vmem>>, %arg3: memref<1x128xf32, #tpu.memory_space<vmem>>, %arg4: memref<128x128xbf16, #tpu.memory_space<vmem>>, %arg5: memref<1x128xf32, #tpu.memory_space<vmem>>, %arg6: memref<128x128xbf16, #tpu.memory_space<vmem>>, %arg7: memref<1x128xf32, #tpu.memory_space<vmem>>, %arg8: memref<128x128xbf16, #tpu.memory_space<vmem>>, %arg9: memref<1x128xf32, #tpu.memory_space<vmem>>, %arg10: memref<128x128xbf16, #tpu.memory_space<vmem>>) attributes {dimension_semantics = [#tpu.dimension_semantics<parallel>], iteration_bounds = array<i64: 1>, scalar_prefetch = 0 : i64, scratch_operands = 0 : i64, tpu.core_type = #tpu.core_type<tc>, window_params = [{transform_indices = @transform_0, window_bounds = array<i64: 128, 784>}, {pipeline_mode = #tpu.pipeline_mode<synchronous>, transform_indices = @transform_1, window_bounds = array<i64: 784, 128>}, {pipeline_mode = #tpu.pipeline_mode<synchronous>, transform_indices = @transform_2, window_bounds = array<i64: 1, 128>}, {pipeline_mode = #tpu.pipeline_mode<synchronous>, transform_indices = @transform_3, window_bounds = array<i64: 128, 128>}, {pipeline_mode = #tpu.pipeline_mode<synchronous>, transform_indices = @transform_4, window_bounds = array<i64: 1, 128>}, {pipeline_mode = #tpu.pipeline_mode<synchronous>, transform_indices = @transform_5, window_bounds = array<i64: 128, 128>}, {pipeline_mode = #tpu.pipeline_mode<synchronous>, transform_indices = @transform_6, window_bounds = array<i64: 1, 128>}, {pipeline_mode = #tpu.pipeline_mode<synchronous>, transform_indices = @transform_7, window_bounds = array<i64: 128, 128>}, {pipeline_mode = #tpu.pipeline_mode<synchronous>, transform_indices = @transform_8, window_bounds = array<i64: 1, 128>}, {transform_indices = @transform_9, window_bounds = array<i64: 128, 128>}]} {
    %c0 = arith.constant 0 : index
    %c0_0 = arith.constant 0 : index
    %0 = vector.load %arg1[%c0, %c0_0] : memref<128x784xf32, #tpu.memory_space<vmem>>, vector<128x784xf32>
    %1 = arith.truncf %0 : vector<128x784xf32> to vector<128x784xbf16>
    %c0_1 = arith.constant 0 : index
    %c0_2 = arith.constant 0 : index
    %2 = vector.load %arg2[%c0_1, %c0_2] : memref<784x128xbf16, #tpu.memory_space<vmem>>, vector<784x128xbf16>
    %cst = arith.constant dense<0.000000e+00> : vector<128x128xf32>
    %3 = tpu.matmul %1, %2, %cst {dimension_numbers = #tpu.dot_dimension_numbers<[1], [0], [0], [1], [0, 0, 1, 1], [], []>} : vector<128x784xbf16>, vector<784x128xbf16>, vector<128x128xf32> -> vector<128x128xf32>
    %c0_3 = arith.constant 0 : index
    %c0_4 = arith.constant 0 : index
    %4 = vector.load %arg3[%c0_3, %c0_4] : memref<1x128xf32, #tpu.memory_space<vmem>>, vector<1x128xf32>
    %5 = vector.broadcast %4 : vector<1x128xf32> to vector<128x128xf32>
    %6 = arith.addf %3, %5 : vector<128x128xf32>
    %cst_5 = arith.constant 0.000000e+00 : f32
    %7 = vector.broadcast %cst_5 : f32 to vector<128x128xf32>
    %8 = arith.maximumf %6, %7 : vector<128x128xf32>
    %9 = arith.truncf %8 : vector<128x128xf32> to vector<128x128xbf16>
    %c0_6 = arith.constant 0 : index
    %c0_7 = arith.constant 0 : index
    %10 = vector.load %arg4[%c0_6, %c0_7] : memref<128x128xbf16, #tpu.memory_space<vmem>>, vector<128x128xbf16>
    %cst_8 = arith.constant dense<0.000000e+00> : vector<128x128xf32>
    %11 = tpu.matmul %9, %10, %cst_8 {dimension_numbers = #tpu.dot_dimension_numbers<[1], [0], [0], [1], [0, 0, 1, 1], [], []>} : vector<128x128xbf16>, vector<128x128xbf16>, vector<128x128xf32> -> vector<128x128xf32>
    %c0_9 = arith.constant 0 : index
    %c0_10 = arith.constant 0 : index
    %12 = vector.load %arg5[%c0_9, %c0_10] : memref<1x128xf32, #tpu.memory_space<vmem>>, vector<1x128xf32>
    %13 = vector.broadcast %12 : vector<1x128xf32> to vector<128x128xf32>
    %14 = arith.addf %11, %13 : vector<128x128xf32>
    %cst_11 = arith.constant 0.000000e+00 : f32
    %15 = vector.broadcast %cst_11 : f32 to vector<128x128xf32>
    %16 = arith.maximumf %14, %15 : vector<128x128xf32>
    %17 = arith.truncf %16 : vector<128x128xf32> to vector<128x128xbf16>
    %c0_12 = arith.constant 0 : index
    %c0_13 = arith.constant 0 : index
    %18 = vector.load %arg6[%c0_12, %c0_13] : memref<128x128xbf16, #tpu.memory_space<vmem>>, vector<128x128xbf16>
    %cst_14 = arith.constant dense<0.000000e+00> : vector<128x128xf32>
    %19 = tpu.matmul %17, %18, %cst_14 {dimension_numbers = #tpu.dot_dimension_numbers<[1], [0], [0], [1], [0, 0, 1, 1], [], []>} : vector<128x128xbf16>, vector<128x128xbf16>, vector<128x128xf32> -> vector<128x128xf32>
    %c0_15 = arith.constant 0 : index
    %c0_16 = arith.constant 0 : index
    %20 = vector.load %arg7[%c0_15, %c0_16] : memref<1x128xf32, #tpu.memory_space<vmem>>, vector<1x128xf32>
    %21 = vector.broadcast %20 : vector<1x128xf32> to vector<128x128xf32>
    %22 = arith.addf %19, %21 : vector<128x128xf32>
    %cst_17 = arith.constant 0.000000e+00 : f32
    %23 = vector.broadcast %cst_17 : f32 to vector<128x128xf32>
    %24 = arith.maximumf %22, %23 : vector<128x128xf32>
    %25 = arith.truncf %24 : vector<128x128xf32> to vector<128x128xbf16>
    %c0_18 = arith.constant 0 : index
    %c0_19 = arith.constant 0 : index
    %26 = vector.load %arg8[%c0_18, %c0_19] : memref<128x128xbf16, #tpu.memory_space<vmem>>, vector<128x128xbf16>
    %cst_20 = arith.constant dense<0.000000e+00> : vector<128x128xf32>
    %27 = tpu.matmul %25, %26, %cst_20 {dimension_numbers = #tpu.dot_dimension_numbers<[1], [0], [0], [1], [0, 0, 1, 1], [], []>} : vector<128x128xbf16>, vector<128x128xbf16>, vector<128x128xf32> -> vector<128x128xf32>
    %c0_21 = arith.constant 0 : index
    %c0_22 = arith.constant 0 : index
    %28 = vector.load %arg9[%c0_21, %c0_22] : memref<1x128xf32, #tpu.memory_space<vmem>>, vector<1x128xf32>
    %29 = vector.broadcast %28 : vector<1x128xf32> to vector<128x128xf32>
    %30 = arith.addf %27, %29 : vector<128x128xf32>
    %31 = arith.truncf %30 : vector<128x128xf32> to vector<128x128xbf16>
    %c0_23 = arith.constant 0 : index
    %c0_24 = arith.constant 0 : index
    %32 = vector.load %arg10[%c0_23, %c0_24] : memref<128x128xbf16, #tpu.memory_space<vmem>>, vector<128x128xbf16>
    tpu.vector_store %arg10[%c0_23, %c0_24], %31 {strides = array<i32>} : memref<128x128xbf16, #tpu.memory_space<vmem>>, vector<128x128xbf16>,
    return
  }
  func.func @transform_0(%arg0: i32) -> (i32, i32) {
    %c0_i32 = arith.constant 0 : i32
    %c0_i32_0 = arith.constant 0 : i32
    return %arg0, %c0_i32 : i32, i32
  }
  func.func @transform_1(%arg0: i32) -> (i32, i32) {
    %c0_i32 = arith.constant 0 : i32
    %c0_i32_0 = arith.constant 0 : i32
    %c0_i32_1 = arith.constant 0 : i32
    return %c0_i32, %c0_i32_0 : i32, i32
  }
  func.func @transform_2(%arg0: i32) -> (i32, i32) {
    %c0_i32 = arith.constant 0 : i32
    %c0_i32_0 = arith.constant 0 : i32
    %c0_i32_1 = arith.constant 0 : i32
    return %c0_i32, %c0_i32_0 : i32, i32
  }
  func.func @transform_3(%arg0: i32) -> (i32, i32) {
    %c0_i32 = arith.constant 0 : i32
    %c0_i32_0 = arith.constant 0 : i32
    %c0_i32_1 = arith.constant 0 : i32
    return %c0_i32, %c0_i32_0 : i32, i32
  }
  func.func @transform_4(%arg0: i32) -> (i32, i32) {
    %c0_i32 = arith.constant 0 : i32
    %c0_i32_0 = arith.constant 0 : i32
    %c0_i32_1 = arith.constant 0 : i32
    return %c0_i32, %c0_i32_0 : i32, i32
  }
  func.func @transform_5(%arg0: i32) -> (i32, i32) {
    %c0_i32 = arith.constant 0 : i32
    %c0_i32_0 = arith.constant 0 : i32
    %c0_i32_1 = arith.constant 0 : i32
    return %c0_i32, %c0_i32_0 : i32, i32
  }
  func.func @transform_6(%arg0: i32) -> (i32, i32) {
    %c0_i32 = arith.constant 0 : i32
    %c0_i32_0 = arith.constant 0 : i32
    %c0_i32_1 = arith.constant 0 : i32
    return %c0_i32, %c0_i32_0 : i32, i32
  }
  func.func @transform_7(%arg0: i32) -> (i32, i32) {
    %c0_i32 = arith.constant 0 : i32
    %c0_i32_0 = arith.constant 0 : i32
    %c0_i32_1 = arith.constant 0 : i32
    return %c0_i32, %c0_i32_0 : i32, i32
  }
  func.func @transform_8(%arg0: i32) -> (i32, i32) {
    %c0_i32 = arith.constant 0 : i32
    %c0_i32_0 = arith.constant 0 : i32
    %c0_i32_1 = arith.constant 0 : i32
    return %c0_i32, %c0_i32_0 : i32, i32
  }
  func.func @transform_9(%arg0: i32) -> (i32, i32) {
    %c0_i32 = arith.constant 0 : i32
    %c0_i32_0 = arith.constant 0 : i32
    return %arg0, %c0_i32 : i32, i32
  }
}

</mosaic_0001>

<bundles_post_ra>
// kernel: tpu_custom_call.1
= control target key start
LH: loop header
LB: loop body
LE: loop exit
PB: predicated region body
PF: predicated region fallthrough
CT: control target
= control target key end

     0   :  { %vm601_vm0 = vcmask 130048   ;;  %s3022_s0 = inlined_call_operand.vmem [shape: f32[128,784], index: 0, kind: input, shape index: {}]   ;;  %s3023_s1 = inlined_call_operand.vmem [shape: bf16[784,128], index: 1, kind: input, shape index: {}]   ;;  %s3024_s2 = inlined_call_operand.vmem [shape: f32[1,128], index: 2, kind: input, shape index: {}]   ;;  %s3025_s3 = inlined_call_operand.vmem [shape: bf16[128,128], index: 3, kind: input, shape index: {}]   ;;  %s3026_s4 = inlined_call_operand.vmem [shape: f32[1,128], index: 4, kind: input, shape index: {}]   ;;  %s3027_s5 = inlined_call_operand.vmem [shape: bf16[128,128], index: 5, kind: input, shape index: {}]   ;;  %s3028_s6 = inlined_call_operand.vmem [shape: f32[1,128], index: 6, kind: input, shape index: {}]   ;;  %s3029_s7 = inlined_call_operand.vmem [shape: bf16[128,128], index: 7, kind: input, shape index: {}]   ;;  %s3030_s8 = inlined_call_operand.vmem [shape: f32[1,128], index: 8, kind: input, shape index: {}]   ;;  %s3031_s9 = inlined_call_operand.hbm [shape: bf16[128,128], index: 9, kind: output, shape index: {}]  }
   0x1   :  { %v2216_v0 = vld [vmem:[%s3023_s1 + $0x40] sm:$0xff]   ;;  %v2220_v4 = vld [vmem:[%s3023_s1 + $0x48] sm:$0xff]   ;;  %v2224_v8 = vld [vmem:[%s3023_s1 + $0x50] sm:$0xff]  }
   0x2   :  { %v2217_v1 = vld [vmem:[%s3023_s1] sm:$0xff]   ;;  %1850 = vmatprep.subr.bf16.mxu0 %v2216_v0  ;;  %v2221_v5 = vld [vmem:[%s3023_s1 + $0x8] sm:$0xff]   ;;  %v2225_v9 = vld [vmem:[%s3023_s1 + $0x10] sm:$0xff]  }
   0x3   :  { %v2218_v2 = vld [vmem:[%s3023_s1 + $0xc0] sm:$0xff]   ;;  %1851 = vmatpush3.bf16.msra.mxu0 %v2217_v1  ;;  %v2222_v6 = vld [vmem:[%s3023_s1 + $0xc8] sm:$0xff]   ;;  %v2226_v10 = vld [vmem:[%s3023_s1 + $0xd0] sm:$0xff]  }
   0x4   :  { %v2219_v3 = vld [vmem:[%s3023_s1 + $0x80] sm:$0xff]   ;;  %1914 = vmatprep.subr.bf16.mxu1 %v2218_v2  ;;  %1852 = vmatprep.subr.bf16.mxu0 %v2220_v4  ;;  %v2223_v7 = vld [vmem:[%s3023_s1 + $0x88] sm:$0xff]   ;;  %v2227_v11 = vld [vmem:[%s3023_s1 + $0x90] sm:$0xff]  }
   0x5   :  { %1915 = vmatpush3.bf16.msra.mxu1 %v2219_v3  ;;  %v2228_v12 = vld [vmem:[%s3023_s1 + $0x58] sm:$0xff]   ;;  %v2232_v16 = vld [vmem:[%s3023_s1 + $0x60] sm:$0xff]   ;;  %v2236_v20 = vld [vmem:[%s3023_s1 + $0x68] sm:$0xff]  }
   0x6   :  { %1916 = vmatprep.subr.bf16.mxu1 %v2222_v6  ;;  %v2229_v13 = vld [vmem:[%s3023_s1 + $0x18] sm:$0xff]   ;;  %v2233_v17 = vld [vmem:[%s3023_s1 + $0x20] sm:$0xff]   ;;  %v2237_v21 = vld [vmem:[%s3023_s1 + $0x28] sm:$0xff]  }
   0x7   :  { %1853 = vmatpush3.bf16.msra.mxu0 %v2221_v5  ;;  %v2230_v14 = vld [vmem:[%s3023_s1 + $0xd8] sm:$0xff]   ;;  %v2234_v18 = vld [vmem:[%s3023_s1 + $0xe0] sm:$0xff]   ;;  %v2238_v22 = vld [vmem:[%s3023_s1 + $0xe8] sm:$0xff]  }
   0x8   :  { %1854 = vmatprep.subr.bf16.mxu0 %v2224_v8  ;;  %v2231_v15 = vld [vmem:[%s3023_s1 + $0x98] sm:$0xff]   ;;  %v2235_v19 = vld [vmem:[%s3023_s1 + $0xa0] sm:$0xff]   ;;  %v2239_v23 = vld [vmem:[%s3023_s1 + $0xa8] sm:$0xff]  }
   0x9   :  { %1917 = vmatpush3.bf16.msra.mxu1 %v2223_v7  ;;  %v2240_v24 = vld [vmem:[%s3023_s1 + $0x70] sm:$0xff]   ;;  %v2244_v28 = vld [vmem:[%s3023_s1 + $0x78] sm:$0xff]   ;;  %v35_v31 = vld [vmem:[%s3022_s0 + $0x8] sm:$0xff] }
   0xa   :  { %1918 = vmatprep.subr.bf16.mxu1 %v2226_v10  ;;  %v2241_v25 = vld [vmem:[%s3023_s1 + $0x30] sm:$0xff]   ;;  %v2245_v29 = vld [vmem:[%s3023_s1 + $0x38] sm:$0xff]   ;;  %v42_v32 = vld [vmem:[%s3022_s0 + $0x40] sm:$0xff] }
   0xb   :  { %1855 = vmatpush3.bf16.msra.mxu0 %v2225_v9  ;;  %v2242_v26 = vld [vmem:[%s3023_s1 + $0xf0] sm:$0xff]   ;;  %v2246_v30 = vld [vmem:[%s3023_s1 + $0xf8] sm:$0xff]   ;;  %v147_v33 = vpack.c.bf16 %v42_v32, %v35_v31  ;;  %v34_v35 = vld [vmem:[%s3022_s0] sm:$0xff] }
   0xc   :  { %1856 = vmatprep.subr.bf16.mxu0 %v2228_v12  ;;  %v2243_v27 = vld [vmem:[%s3023_s1 + $0xb0] sm:$0xff]   ;;  %v2247_v34 = vld [vmem:[%s3023_s1 + $0xb8] sm:$0xff]   ;;  %v2248_v38 = vld [vmem:[%s3023_s1 + $0x140] sm:$0xff]  }
   0xd   :  { %1919 = vmatpush3.bf16.msra.mxu1 %v2227_v11  ;;  %v41_v36 = vld [vmem:[%s3022_s0 + $0x38] sm:$0xff]  ;;  %658 = vmatprep.mubr.bf16.mxu0 %v147_v33  ;;  %v44_v40 = vld [vmem:[%s3022_s0 + $0x50] sm:$0xff]  ;;  %v2249_v42 = vld [vmem:[%s3023_s1 + $0x100] sm:$0xff]  }
   0xe   :  { %1920 = vmatprep.subr.bf16.mxu1 %v2230_v14  ;;  %v146_v37 = vpack.c.bf16 %v41_v36, %v34_v35  ;;  %v37_v39 = vld [vmem:[%s3022_s0 + $0x18] sm:$0xff]  ;;  %v36_v43 = vld [vmem:[%s3022_s0 + $0x10] sm:$0xff]  ;;  %v43_v44 = vld [vmem:[%s3022_s0 + $0x48] sm:$0xff] }
   0xf   :  { %1857 = vmatpush3.bf16.msra.mxu0 %v2229_v13  ;;  %v149_v41 = vpack.c.bf16 %v44_v40, %v37_v39  ;;  %v49_v45 = vld [vmem:[%s3022_s0 + $0x78] sm:$0xff]  ;;  %v148_v46 = vpack.c.bf16 %v43_v44, %v36_v43  ;;  %v56_v47 = vld [vmem:[%s3022_s0 + $0xb0] sm:$0xff]  ;;  %v55_v49 = vld [vmem:[%s3022_s0 + $0xa8] sm:$0xff] }
  0x10   :  { %1858 = vmatprep.subr.bf16.mxu0 %v2232_v16  ;;  %v48_v48 = vld [vmem:[%s3022_s0 + $0x70] sm:$0xff]  ;;  %v154_v50 = vpack.c.bf16 %v56_v47, %v49_v45  ;;  %v2250_v51 = vld [vmem:[%s3023_s1 + $0x148] sm:$0xff]   ;;  %v58_v53 = vld [vmem:[%s3022_s0 + $0xc0] sm:$0xff] }
  0x11   :  { %1921 = vmatpush3.bf16.msra.mxu1 %v2231_v15  ;;  %755 = vmatprep.mubr.bf16.mxu1 %v149_v41  ;;  %v51_v52 = vld [vmem:[%s3022_s0 + $0x88] sm:$0xff]  ;;  %v153_v54 = vpack.c.bf16 %v55_v49, %v48_v48  ;;  %v50_v57 = vld [vmem:[%s3022_s0 + $0x80] sm:$0xff]  ;;  %v57_v58 = vld [vmem:[%s3022_s0 + $0xb8] sm:$0xff] }
  0x12   :  { %1922 = vmatprep.subr.bf16.mxu1 %v2234_v18  ;;  %v156_v55 = vpack.c.bf16 %v58_v53, %v51_v52  ;;  %v2251_v56 = vld [vmem:[%s3023_s1 + $0x108] sm:$0xff]   ;;  %v70_v60 = vld [vmem:[%s3022_s0 + $0x120] sm:$0xff]  ;;  %v155_v62 = vpack.c.bf16 %v57_v58, %v50_v57  ;;  %v2252_v63 = vld [vmem:[%s3023_s1 + $0x150] sm:$0xff]  }
  0x13   :  { %1859 = vmatpush3.bf16.msra.mxu0 %v2233_v17  ;;  %v63_v59 = vld [vmem:[%s3022_s0 + $0xe8] sm:$0xff]  ;;  %v65_v0 = vld [vmem:[%s3022_s0 + $0xf8] sm:$0xff]  ;;  %v72_v1 = vld [vmem:[%s3022_s0 + $0x130] sm:$0xff] }
  0x14   :  { %1860 = vmatprep.subr.bf16.mxu0 %v2236_v20  ;;  %v161_v61 = vpack.c.bf16 %v70_v60, %v63_v59  ;;  %v62_v2 = vld [vmem:[%s3022_s0 + $0xe0] sm:$0xff]  ;;  %v69_v3 = vld [vmem:[%s3022_s0 + $0x118] sm:$0xff]  ;;  %v163_v4 = vpack.c.bf16 %v72_v1, %v65_v0  ;;  %v2253_v5 = vld [vmem:[%s3023_s1 + $0x110] sm:$0xff]  }
  0x15   :  { %1923 = vmatpush3.bf16.msra.mxu1 %v2235_v19  ;;  %v64_v6 = vld [vmem:[%s3022_s0 + $0xf0] sm:$0xff]  ;;  %v77_v7 = vld [vmem:[%s3022_s0 + $0x158] sm:$0xff]  ;;  %v71_v9 = vld [vmem:[%s3022_s0 + $0x128] sm:$0xff]  ;;  %v160_v10 = vpack.c.bf16 %v69_v3, %v62_v2 }
  0x16   :  { %1924 = vmatprep.subr.bf16.mxu1 %v2238_v22  ;;  %v84_v8 = vld [vmem:[%s3022_s0 + $0x190] sm:$0xff]  ;;  %v2254_v11 = vld [vmem:[%s3023_s1 + $0x158] sm:$0xff]   ;;  %v79_v12 = vld [vmem:[%s3022_s0 + $0x168] sm:$0xff]  ;;  %v162_v16 = vpack.c.bf16 %v71_v9, %v64_v6 }
  0x17   :  { %1861 = vmatpush3.bf16.msra.mxu0 %v2237_v21  ;;  %v86_v13 = vld [vmem:[%s3022_s0 + $0x1a0] sm:$0xff]  ;;  %v168_v14 = vpack.c.bf16 %v84_v8, %v77_v7  ;;  %v2255_v15 = vld [vmem:[%s3023_s1 + $0x118] sm:$0xff]   ;;  %v76_v17 = vld [vmem:[%s3022_s0 + $0x150] sm:$0xff] }
  0x18   :  { %1862 = vmatprep.subr.bf16.mxu0 %v2240_v24  ;;  %v170_v18 = vpack.c.bf16 %v86_v13, %v79_v12  ;;  %v2256_v19 = vld [vmem:[%s3023_s1 + $0x160] sm:$0xff]   ;;  %v83_v20 = vld [vmem:[%s3022_s0 + $0x188] sm:$0xff]  ;;  %v97_v36 = vld [vmem:[%s3022_s0 + $0x1f8] sm:$0xff] }
  0x19   :  { %1925 = vmatpush3.bf16.msra.mxu1 %v2239_v23  ;;  %v91_v21 = vld [vmem:[%s3022_s0 + $0x1c8] sm:$0xff]  ;;  %v98_v22 = vld [vmem:[%s3022_s0 + $0x200] sm:$0xff]  ;;  %v167_v24 = vpack.c.bf16 %v83_v20, %v76_v17  ;;  %v92_v39 = vld [vmem:[%s3022_s0 + $0x1d0] sm:$0xff] }
  0x1a   :  { %1926 = vmatprep.subr.bf16.mxu1 %v2242_v26  ;;  %v2257_v23 = vld [vmem:[%s3023_s1 + $0x120] sm:$0xff]   ;;  %v85_v26 = vld [vmem:[%s3022_s0 + $0x198] sm:$0xff]  ;;  %v2259_v31 = vld [vmem:[%s3023_s1 + $0x168] sm:$0xff]  }
  0x1b   :  { %1863 = vmatpush3.bf16.msra.mxu0 %v2241_v25  ;;  %v78_v25 = vld [vmem:[%s3022_s0 + $0x160] sm:$0xff]  ;;  %v99_v40 = vld [vmem:[%s3022_s0 + $0x208] sm:$0xff]  ;;  %v2261_v41 = vld [vmem:[%s3023_s1 + $0x170] sm:$0xff]  }
  0x1c   :  { %1864 = vmatprep.subr.bf16.mxu0 %v2244_v28  ;;  %v175_v28 = vpack.c.bf16 %v98_v22, %v91_v21  ;;  %v169_v32 = vpack.c.bf16 %v85_v26, %v78_v25  ;;  %v90_v35 = vld [vmem:[%s3022_s0 + $0x1c0] sm:$0xff]  ;;  %v2262_v43 = vld [vmem:[%s3023_s1 + $0x130] sm:$0xff]   ;;  %v107_v45 = vld [vmem:[%s3022_s0 + $0x248] sm:$0xff]  ;;  %v176_v47 = vpack.c.bf16 %v99_v40, %v92_v39 }
  0x1d   :  { %1927 = vmatpush3.bf16.msra.mxu1 %v2243_v27  ;;  %v2258_v27 = vld [vmem:[%s3023_s1 + $0x180] sm:$0xff]   ;;  %v2263_v48 = vld [vmem:[%s3023_s1 + $0x178] sm:$0xff]   ;;  %v104_v49 = vld [vmem:[%s3022_s0 + $0x230] sm:$0xff] }
  0x1e   :  { %1928 = vmatprep.subr.bf16.mxu1 %v2246_v30  ;;  %v100_v30 = vld [vmem:[%s3022_s0 + $0x210] sm:$0xff]  ;;  %v2264_v52 = vld [vmem:[%s3023_s1 + $0x138] sm:$0xff]   ;;  %v119_v53 = vld [vmem:[%s3022_s0 + $0x2a8] sm:$0xff] }
  0x1f   :  { %1865 = vmatpush3.bf16.msra.mxu0 %v2245_v29  ;;  %v93_v29 = vld [vmem:[%s3022_s0 + $0x1d8] sm:$0xff]  ;;  %v128_v60 = vld [vmem:[%s3022_s0 + $0x2f0] sm:$0xff]  ;;  %v135_v7 = vld [vmem:[%s3022_s0 + $0x328] sm:$0xff] }
  0x20   :  { %1978 = vmatprep.subr.bf16.mxu0 %v2248_v38  ;;  %v177_v33 = vpack.c.bf16 %v100_v30, %v93_v29  ;;  %v112_v38 = vld [vmem:[%s3022_s0 + $0x270] sm:$0xff]  ;;  %v113_v57 = vld [vmem:[%s3022_s0 + $0x278] sm:$0xff]  ;;  %v142_v8 = vld [vmem:[%s3022_s0 + $0x360] sm:$0xff] }
  0x21   :  { %1929 = vmatpush3.bf16.msra.mxu1 %v2247_v34  ;;  %v2260_v34 = vld [vmem:[%s3023_s1 + $0x128] sm:$0xff]   ;;  %v121_v59 = vld [vmem:[%s3022_s0 + $0x2b8] sm:$0xff]  ;;  %v140_v2 = vld [vmem:[%s3022_s0 + $0x350] sm:$0xff] }
  0x22   :  { %659 = vmatmul.mubr.bf16.vlgmr.msra.gmra.mrb[0].mxu0 %v146_v37  ;;  %2099 = vmatprep.subr.bf16.mxu1 %v2258_v27  ;;  %v105_v37 = vld [vmem:[%s3022_s0 + $0x238] sm:$0xff]  ;;  %v139_v12 = vld [vmem:[%s3022_s0 + $0x348] sm:$0xff]  ;;  %v40_v17 = vld [vmem:[%s3022_s0 + $0x30] sm:$0xff] }
  0x23   :  { %1979 = vmatpush3.bf16.msra.mxu0 %v2249_v42  ;;  %666 = vmatprep.mubr.bf16.mxu0 %v154_v50  ;;  %v174_v42 = vpack.c.bf16 %v97_v36, %v90_v35  ;;  %v182_v44 = vpack.c.bf16 %v112_v38, %v105_v37  ;;  %v125_v0 = vld [vmem:[%s3022_s0 + $0x2d8] sm:$0xff]  ;;  %v39_v13 = vld [vmem:[%s3022_s0 + $0x28] sm:$0xff]  ;;  %v38_v22 = vld [vmem:[%s3022_s0 + $0x20] sm:$0xff] }
  0x24   :  { %756 = vmatmul.mubr.bf16.vlgmr.msra.gmra.mrb[0].mxu1 %v148_v46  ;;  %1980 = vmatprep.subr.bf16.mxu0 %v2250_v51  ;;  %v114_v46 = vld [vmem:[%s3022_s0 + $0x280] sm:$0xff]  ;;  %v111_v51 = vld [vmem:[%s3022_s0 + $0x268] sm:$0xff]  ;;  %v133_v1 = vld [vmem:[%s3022_s0 + $0x318] sm:$0xff] }
  0x25   :  { %763 = vmatprep.mubr.bf16.mxu1 %v156_v55  ;;  %2100 = vmatpush3.bf16.msra.mxu1 %v2258_v27  ;;  %v184_v50 = vpack.c.bf16 %v114_v46, %v107_v45  ;;  %v181_v55 = vpack.c.bf16 %v111_v51, %v104_v49  ;;  %v196_v6 = vpack.c.bf16 %v140_v2, %v133_v1  ;;  %v53_v25 = vld [vmem:[%s3022_s0 + $0x98] sm:$0xff]  ;;  %v60_v26 = vld [vmem:[%s3022_s0 + $0xd0] sm:$0xff]  ;;  %v54_v27 = vld [vmem:[%s3022_s0 + $0xa0] sm:$0xff] }
  0x26   :  { %v68_v29 = vld [vmem:[%s3022_s0 + $0x110] sm:$0xff]  ;;  %v75_v30 = vld [vmem:[%s3022_s0 + $0x148] sm:$0xff]  ;;  %v74_v38 = vld [vmem:[%s3022_s0 + $0x140] sm:$0xff] }
  0x27   :  { %1981 = vmatpush3.bf16.msra.mxu0 %v2251_v56  ;;  %v106_v56 = vld [vmem:[%s3022_s0 + $0x240] sm:$0xff]  ;;  %v59_v35 = vld [vmem:[%s3022_s0 + $0xc8] sm:$0xff]  ;;  %v166_v37 = vpack.c.bf16 %v75_v30, %v68_v29 }
  0x28   :  { %1982 = vmatprep.subr.bf16.mxu0 %v2252_v63  ;;  %v118_v63 = vld [vmem:[%s3022_s0 + $0x2a0] sm:$0xff]  ;;  %v67_v36 = vld [vmem:[%s3022_s0 + $0x108] sm:$0xff] }
  0x29   :  { %v188_v3 = vpack.c.bf16 %v125_v0, %v118_v63 }
  0x2a   :  { %667 = vmatmul.mubr.bf16.gmra.mrb[4].mxu0 %v153_v54  ;;  %v126_v54 = vld [vmem:[%s3022_s0 + $0x2e0] sm:$0xff] }
  0x2b   :  { %674 = vmatprep.mubr.bf16.mxu0 %v161_v61  ;;  %1983 = vmatpush3.bf16.msra.mxu0 %v2253_v5  ;;  %v189_v58 = vpack.c.bf16 %v126_v54, %v119_v53  ;;  %v183_v61 = vpack.c.bf16 %v113_v57, %v106_v56  ;;  %v127_v5 = vld [vmem:[%s3022_s0 + $0x2e8] sm:$0xff] }
  0x2c   :  { %764 = vmatmul.mubr.bf16.gmra.mrb[4].mxu1 %v155_v62  ;;  %1984 = vmatprep.subr.bf16.mxu0 %v2254_v11  ;;  %v191_v62 = vpack.c.bf16 %v128_v60, %v121_v59  ;;  %v132_v11 = vld [vmem:[%s3022_s0 + $0x310] sm:$0xff] }
  0x2d   :  { %771 = vmatprep.mubr.bf16.mxu1 %v163_v4  ;;  %v120_v4 = vld [vmem:[%s3022_s0 + $0x2b0] sm:$0xff] }
  0x2e   :  { %v190_v9 = vpack.c.bf16 %v127_v5, %v120_v4 }
  0x2f   :  { %1985 = vmatpush3.bf16.msra.mxu0 %v2255_v15  ;;  %v141_v15 = vld [vmem:[%s3022_s0 + $0x358] sm:$0xff] }
  0x30   :  { %1986 = vmatprep.subr.bf16.mxu0 %v2256_v19  ;;  %v195_v19 = vpack.c.bf16 %v139_v12, %v132_v11 }
  0x32   :  { %675 = vmatmul.mubr.bf16.gmra.mrb[8].mxu0 %v160_v10  ;;  %v198_v10 = vpack.c.bf16 %v142_v8, %v135_v7 }
  0x33   :  { %682 = vmatprep.mubr.bf16.mxu0 %v168_v14  ;;  %1987 = vmatpush3.bf16.msra.mxu0 %v2257_v23  ;;  %v134_v14 = vld [vmem:[%s3022_s0 + $0x320] sm:$0xff]  ;;  %v45_v23 = vld [vmem:[%s3022_s0 + $0x58] sm:$0xff] }
  0x34   :  { %772 = vmatmul.mubr.bf16.gmra.mrb[8].mxu1 %v162_v16  ;;  %1988 = vmatprep.subr.bf16.mxu0 %v2259_v31  ;;  %v46_v16 = vld [vmem:[%s3022_s0 + $0x60] sm:$0xff]  ;;  %v197_v21 = vpack.c.bf16 %v141_v15, %v134_v14  ;;  %v150_v31 = vpack.c.bf16 %v45_v23, %v38_v22 }
  0x35   :  { %779 = vmatprep.mubr.bf16.mxu1 %v170_v18  ;;  %v47_v18 = vld [vmem:[%s3022_s0 + $0x68] sm:$0xff]  ;;  %v151_v20 = vpack.c.bf16 %v46_v16, %v39_v13 }
  0x37   :  { %1989 = vmatpush3.bf16.msra.mxu0 %v2260_v34  ;;  %v52_v34 = vld [vmem:[%s3022_s0 + $0x90] sm:$0xff] }
  0x38   :  { %1990 = vmatprep.subr.bf16.mxu0 %v2261_v41 }
  0x3a   :  { %683 = vmatmul.mubr.bf16.gmra.mrb[12].mxu0 %v167_v24  ;;  %v152_v24 = vpack.c.bf16 %v47_v18, %v40_v17 }
  0x3b   :  { %690 = vmatprep.mubr.bf16.mxu0 %v175_v28  ;;  %1991 = vmatpush3.bf16.msra.mxu0 %v2262_v43  ;;  %v61_v28 = vld [vmem:[%s3022_s0 + $0xd8] sm:$0xff] }
  0x3c   :  { %780 = vmatmul.mubr.bf16.gmra.mrb[12].mxu1 %v169_v32  ;;  %1992 = vmatprep.subr.bf16.mxu0 %v2263_v48  ;;  %v158_v32 = vpack.c.bf16 %v60_v26, %v53_v25 }
  0x3d   :  { %787 = vmatprep.mubr.bf16.mxu1 %v177_v33  ;;  %v159_v33 = vpack.c.bf16 %v61_v28, %v54_v27 }
  0x3f   :  { %1993 = vmatpush3.bf16.msra.mxu0 %v2264_v52 }
  0x42   :  { %691 = vmatmul.mubr.bf16.gmra.mrb[16].mxu0 %v174_v42 }
  0x43   :  { %698 = vmatprep.mubr.bf16.mxu0 %v182_v44 }
  0x44   :  { %788 = vmatmul.mubr.bf16.gmra.mrb[16].mxu1 %v176_v47 }
  0x45   :  { %795 = vmatprep.mubr.bf16.mxu1 %v184_v50 }
  0x4a   :  { %699 = vmatmul.mubr.bf16.gmra.mrb[20].mxu0 %v181_v55 }
  0x4b   :  { %706 = vmatprep.mubr.bf16.mxu0 %v189_v58 }
  0x4c   :  { %796 = vmatmul.mubr.bf16.gmra.mrb[20].mxu1 %v183_v61 }
  0x4d   :  { %803 = vmatprep.mubr.bf16.mxu1 %v191_v62 }
  0x52   :  { %707 = vmatmul.mubr.bf16.gmra.mrb[24].mxu0 %v188_v3 }
  0x53   :  { %714 = vmatprep.mubr.bf16.mxu0 %v196_v6 }
  0x54   :  { %804 = vmatmul.mubr.bf16.gmra.mrb[24].mxu1 %v190_v9 }
  0x55   :  { %811 = vmatprep.mubr.bf16.mxu1 %v198_v10 }
  0x5a   :  { %715 = vmatmul.mubr.bf16.gmra.mrb[28].mxu0 %v195_v19 }
  0x5b   :  { %852 = vmatprep.mubr.bf16.mxu0 %v151_v20 }
  0x5c   :  { %812 = vmatmul.mubr.bf16.gmra.mrb[28].mxu1 %v197_v21 }
  0x5d   :  { %2101 = vmatprep.mubr.msk.bf16.mxu1 %vm601_vm0, %v152_v24 }
  0x62   :  { %853 = vmatmul.mubr.bf16.vlgmr.msra.gmra.mrb[32].mxu0 %v150_v31 }
  0x63   :  { %860 = vmatprep.mubr.bf16.mxu0 %v158_v32 }
  0x64   :  { %14 = vsyncpa [#allocation3], 0  ;;  %2102 = vmatmul.mubr.msk.bf16.vlgmr.msra.gmra.mrb[32].mxu1 %vm601_vm0, %v159_v33  ;;  %v157_v39 = vpack.c.bf16 %v59_v35, %v52_v34  ;;  %v82_v40 = vld [vmem:[%s3022_s0 + $0x180] sm:$0xff]  ;;  %v89_v41 = vld [vmem:[%s3022_s0 + $0x1b8] sm:$0xff]  ;;  %v165_v42 = vpack.c.bf16 %v74_v38, %v67_v36 }
  0x65   :  { %2105 = vmatprep.mubr.msk.bf16.mxu1 %vm601_vm0, %v166_v37  ;;  %v96_v43 = vld [vmem:[%s3022_s0 + $0x1f0] sm:$0xff]  ;;  %v103_v44 = vld [vmem:[%s3022_s0 + $0x228] sm:$0xff]  ;;  %v173_v45 = vpack.c.bf16 %v89_v41, %v82_v40  ;;  %v66_v47 = vld [vmem:[%s3022_s0 + $0x100] sm:$0xff] }
  0x66   :  { %v180_v46 = vpack.c.bf16 %v103_v44, %v96_v43  ;;  %v73_v48 = vld [vmem:[%s3022_s0 + $0x138] sm:$0xff]  ;;  %v88_v50 = vld [vmem:[%s3022_s0 + $0x1b0] sm:$0xff]  ;;  %v110_v52 = vld [vmem:[%s3022_s0 + $0x260] sm:$0xff] }
  0x67   :  { %v81_v49 = vld [vmem:[%s3022_s0 + $0x178] sm:$0xff]  ;;  %v164_v51 = vpack.c.bf16 %v73_v48, %v66_v47  ;;  %v124_v55 = vld [vmem:[%s3022_s0 + $0x2d0] sm:$0xff]  ;;  %v131_v56 = vld [vmem:[%s3022_s0 + $0x308] sm:$0xff] }
  0x68   :  { %v117_v53 = vld [vmem:[%s3022_s0 + $0x298] sm:$0xff]  ;;  %v172_v54 = vpack.c.bf16 %v88_v50, %v81_v49  ;;  %v194_v58 = vpack.c.bf16 %v131_v56, %v124_v55  ;;  %v80_v59 = vld [vmem:[%s3022_s0 + $0x170] sm:$0xff]  ;;  %v87_v60 = vld [vmem:[%s3022_s0 + $0x1a8] sm:$0xff] }
  0x69   :  { %v187_v57 = vpack.c.bf16 %v117_v53, %v110_v52  ;;  %v95_v61 = vld [vmem:[%s3022_s0 + $0x1e8] sm:$0xff]  ;;  %v102_v62 = vld [vmem:[%s3022_s0 + $0x220] sm:$0xff]  ;;  %v171_v63 = vpack.c.bf16 %v87_v60, %v80_v59  ;;  %v145_v1 = vld [vmem:[%s3022_s0 + $0x378] sm:$0xff] }
  0x6a   :  { %861 = vmatmul.mubr.bf16.gmra.mrb[36].mxu0 %v157_v39  ;;  %v138_v0 = vld [vmem:[%s3022_s0 + $0x340] sm:$0xff]  ;;  %v179_v2 = vpack.c.bf16 %v102_v62, %v95_v61  ;;  %v101_v5 = vld [vmem:[%s3022_s0 + $0x218] sm:$0xff]  ;;  %v116_v7 = vld [vmem:[%s3022_s0 + $0x290] sm:$0xff] }
  0x6b   :  { %868 = vmatprep.mubr.bf16.mxu0 %v165_v42  ;;  %v201_v3 = vpack.c.bf16 %v145_v1, %v138_v0  ;;  %v94_v4 = vld [vmem:[%s3022_s0 + $0x1e0] sm:$0xff]  ;;  %v109_v6 = vld [vmem:[%s3022_s0 + $0x258] sm:$0xff]  ;;  %v108_v10 = vld [vmem:[%s3022_s0 + $0x250] sm:$0xff] }
  0x6c   :  { %2106 = vmatmul.mubr.msk.bf16.gmra.mrb[36].mxu1 %vm601_vm0, %v173_v45  ;;  %v178_v8 = vpack.c.bf16 %v101_v5, %v94_v4  ;;  %v186_v9 = vpack.c.bf16 %v116_v7, %v109_v6  ;;  %v115_v11 = vld [vmem:[%s3022_s0 + $0x288] sm:$0xff]  ;;  %v130_v13 = vld [vmem:[%s3022_s0 + $0x300] sm:$0xff]  ;;  %v129_v17 = vld [vmem:[%s3022_s0 + $0x2f8] sm:$0xff] }
  0x6d   :  { %2109 = vmatprep.mubr.msk.bf16.mxu1 %vm601_vm0, %v180_v46  ;;  %v123_v12 = vld [vmem:[%s3022_s0 + $0x2c8] sm:$0xff]  ;;  %v185_v14 = vpack.c.bf16 %v115_v11, %v108_v10  ;;  %v122_v16 = vld [vmem:[%s3022_s0 + $0x2c0] sm:$0xff]  ;;  %v137_v18 = vld [vmem:[%s3022_s0 + $0x338] sm:$0xff] }
  0x6e   :  { %v193_v15 = vpack.c.bf16 %v130_v13, %v123_v12  ;;  %v144_v19 = vld [vmem:[%s3022_s0 + $0x370] sm:$0xff]  ;;  %v192_v20 = vpack.c.bf16 %v129_v17, %v122_v16  ;;  %v143_v23 = vld [vmem:[%s3022_s0 + $0x368] sm:$0xff]  ;;  %v2265_v25 = vld [vmem:[%s3025_s3] sm:$0xff]  }
  0x6f   :  { %v200_v21 = vpack.c.bf16 %v144_v19, %v137_v18  ;;  %v136_v22 = vld [vmem:[%s3022_s0 + $0x330] sm:$0xff]  ;;  %2117 = vmatprep.subr.bf16.mxu1 %v2265_v25  ;;  %v2266_v26 = vld [vmem:[%s3025_s3 + $0x8] sm:$0xff]   ;;  %v2268_v28 = vld [vmem:[%s3025_s3 + $0x18] sm:$0xff]  }
  0x70   :  { %v199_v24 = vpack.c.bf16 %v143_v23, %v136_v22  ;;  %2118 = vmatpush3.bf16.msra.mxu1 %v2265_v25  ;;  %v2267_v27 = vld [vmem:[%s3025_s3 + $0x10] sm:$0xff]   ;;  %v2269_v29 = vld [vmem:[%s3025_s3 + $0x20] sm:$0xff]   ;;  %v2270_v30 = vld [vmem:[%s3025_s3 + $0x28] sm:$0xff]  }
  0x71   :  { %2119 = vmatprep.subr.bf16.mxu1 %v2266_v26  ;;  %v2271_v31 = vld [vmem:[%s3025_s3 + $0x30] sm:$0xff]   ;;  %v2272_v32 = vld [vmem:[%s3025_s3 + $0x38] sm:$0xff]   ;;  %v2884_v34 = vld [vmem:[%s3024_s2] ss:$0 sm:$0xff] }
  0x72   :  { %869 = vmatmul.mubr.bf16.gmra.mrb[40].mxu0 %v164_v51  ;;  %v2273_v47 = vld [vmem:[%s3027_s5] sm:$0xff]   ;;  %v2274_v48 = vld [vmem:[%s3027_s5 + $0x8] sm:$0xff]   ;;  %v2275_v56 = vld [vmem:[%s3027_s5 + $0x10] sm:$0xff]  }
  0x73   :  { %876 = vmatprep.mubr.bf16.mxu0 %v172_v54  ;;  %2149 = vmatprep.subr.bf16.mxu0 %v2273_v47  ;;  %v2277_v10 = vld [vmem:[%s3027_s5 + $0x20] sm:$0xff]  }
  0x74   :  { %2110 = vmatmul.mubr.msk.bf16.gmra.mrb[40].mxu1 %vm601_vm0, %v187_v57  ;;  %2150 = vmatpush3.bf16.msra.mxu0 %v2273_v47 }
  0x75   :  { %2113 = vmatprep.mubr.msk.bf16.mxu1 %vm601_vm0, %v194_v58  ;;  %2120 = vmatpush3.bf16.msra.mxu1 %v2266_v26 }
  0x76   :  { %2121 = vmatprep.subr.bf16.mxu1 %v2267_v27  ;;  %2151 = vmatprep.subr.bf16.mxu0 %v2274_v48 }
  0x78   :  { %2152 = vmatpush3.bf16.msra.mxu0 %v2274_v48 }
  0x79   :  { %2122 = vmatpush3.bf16.msra.mxu1 %v2267_v27  ;;  %2153 = vmatprep.subr.bf16.mxu0 %v2275_v56 }
  0x7a   :  { %877 = vmatmul.mubr.bf16.gmra.mrb[44].mxu0 %v171_v63  ;;  %2123 = vmatprep.subr.bf16.mxu1 %v2268_v28 }
  0x7b   :  { %884 = vmatprep.mubr.bf16.mxu0 %v179_v2  ;;  %v2276_v2 = vld [vmem:[%s3027_s5 + $0x18] sm:$0xff]  }
  0x7c   :  { %2114 = vmatmul.mubr.msk.bf16.gmra.mrb[44].mxu1 %vm601_vm0, %v201_v3  ;;  %2154 = vmatpush3.bf16.msra.mxu0 %v2275_v56 }
  0x7d   :  { %2124 = vmatpush3.bf16.msra.mxu1 %v2268_v28  ;;  %2155 = vmatprep.subr.bf16.mxu0 %v2276_v2 }
  0x7e   :  { %2125 = vmatprep.subr.bf16.mxu1 %v2269_v29 }
  0x80   :  { %2156 = vmatpush3.bf16.msra.mxu0 %v2276_v2 }
  0x81   :  { %2126 = vmatpush3.bf16.msra.mxu1 %v2269_v29  ;;  %2157 = vmatprep.subr.bf16.mxu0 %v2277_v10 }
  0x82   :  { %885 = vmatmul.mubr.bf16.gmra.mrb[48].mxu0 %v178_v8  ;;  %2127 = vmatprep.subr.bf16.mxu1 %v2270_v30 }
  0x83   :  { %892 = vmatprep.mubr.bf16.mxu0 %v186_v9 }
  0x84   :  { %2158 = vmatpush3.bf16.msra.mxu0 %v2277_v10 }
  0x85   :  { %2128 = vmatpush3.bf16.msra.mxu1 %v2270_v30 }
  0x86   :  { %2129 = vmatprep.subr.bf16.mxu1 %v2271_v31 }
  0x89   :  { %2130 = vmatpush3.bf16.msra.mxu1 %v2271_v31 }
  0x8a   :  { %893 = vmatmul.mubr.bf16.gmra.mrb[52].mxu0 %v185_v14  ;;  %2131 = vmatprep.subr.bf16.mxu1 %v2272_v32 }
  0x8b   :  { %900 = vmatprep.mubr.bf16.mxu0 %v193_v15 }
  0x8d   :  { %2132 = vmatpush3.bf16.msra.mxu1 %v2272_v32 }
  0x92   :  { %901 = vmatmul.mubr.bf16.gmra.mrb[56].mxu0 %v192_v20  ;;  %v2278_v20 = vld [vmem:[%s3027_s5 + $0x28] sm:$0xff]  }
  0x93   :  { %908 = vmatprep.mubr.bf16.mxu0 %v200_v21  ;;  %2159 = vmatprep.subr.bf16.mxu0 %v2278_v20 }
  0x94   :  { %2160 = vmatpush3.bf16.msra.mxu0 %v2278_v20 }
  0x9a   :  { %909 = vmatmul.mubr.bf16.gmra.mrb[60].mxu0 %v199_v24 }
  0xf5   :  { %v1866_v33 = vpop.f32.mrb[0].mxu0 }
  0xf6   :  { %v1867_v35 = vpop.f32.mrb[1].mxu0 }
  0xf7   :  { %v1868_v36 = vadd.f32 %v1867_v35, %v1866_v33  ;;  %v1869_v37 = vpop.f32.mrb[2].mxu0  ;;  %v1930_v38 = vpop.f32.mrb[0].mxu1 }
  0xf8   :  { %v1870_v39 = vpop.f32.mrb[3].mxu0  ;;  %v1931_v42 = vpop.f32.mrb[1].mxu1 }
  0xf9   :  { %v661_v40 = vadd.f32 %v1868_v36, %v2884_v34  ;;  %v1871_v41 = vadd.f32 %v1870_v39, %v1869_v37  ;;  %v1932_v43 = vadd.f32 %v1931_v42, %v1930_v38  ;;  %v1933_v44 = vpop.f32.mrb[2].mxu1 }
  0xfa   :  { %v1934_v46 = vpop.f32.mrb[3].mxu1 }
  0xfb   :  { %v664_v45 = vadd.f32 %v1871_v41, %v2884_v34  ;;  %v2894_v49 = vadd.f32 %v1932_v43, %v661_v40  ;;  %v1935_v50 = vadd.f32 %v1934_v46, %v1933_v44 }
  0xfd   :  { %v1872_v51 = vpop.f32.mrb[4].mxu0  ;;  %v2896_v52 = vadd.f32 %v1935_v50, %v664_v45 }
  0xfe   :  { %v1873_v53 = vpop.f32.mrb[5].mxu0 }
  0xff   :  { %v1874_v54 = vadd.f32 %v1873_v53, %v1872_v51  ;;  %v1875_v55 = vpop.f32.mrb[6].mxu0  ;;  %v1936_v57 = vpop.f32.mrb[4].mxu1 }
 0x100   :  { %v1876_v58 = vpop.f32.mrb[7].mxu0  ;;  %v1937_v61 = vpop.f32.mrb[5].mxu1 }
 0x101   :  { %v669_v59 = vadd.f32 %v1874_v54, %v2884_v34  ;;  %v1877_v60 = vadd.f32 %v1876_v58, %v1875_v55  ;;  %v1938_v62 = vadd.f32 %v1937_v61, %v1936_v57  ;;  %v1939_v63 = vpop.f32.mrb[6].mxu1 }
 0x102   :  { %v1940_v1 = vpop.f32.mrb[7].mxu1 }
 0x103   :  { %v672_v0 = vadd.f32 %v1877_v60, %v2884_v34  ;;  %v2906_v3 = vadd.f32 %v1938_v62, %v669_v59  ;;  %v1941_v4 = vadd.f32 %v1940_v1, %v1939_v63 }
 0x105   :  { %v1878_v5 = vpop.f32.mrb[8].mxu0  ;;  %v2908_v6 = vadd.f32 %v1941_v4, %v672_v0 }
 0x106   :  { %v1879_v7 = vpop.f32.mrb[9].mxu0 }
 0x107   :  { %v1880_v8 = vadd.f32 %v1879_v7, %v1878_v5  ;;  %v1881_v9 = vpop.f32.mrb[10].mxu0  ;;  %v1942_v11 = vpop.f32.mrb[8].mxu1 }
 0x108   :  { %v1882_v12 = vpop.f32.mrb[11].mxu0  ;;  %v1943_v15 = vpop.f32.mrb[9].mxu1 }
 0x109   :  { %v677_v13 = vadd.f32 %v1880_v8, %v2884_v34  ;;  %v1883_v14 = vadd.f32 %v1882_v12, %v1881_v9  ;;  %v1944_v16 = vadd.f32 %v1943_v15, %v1942_v11  ;;  %v1945_v17 = vpop.f32.mrb[10].mxu1 }
 0x10a   :  { %v1946_v19 = vpop.f32.mrb[11].mxu1 }
 0x10b   :  { %v680_v18 = vadd.f32 %v1883_v14, %v2884_v34  ;;  %v2918_v21 = vadd.f32 %v1944_v16, %v677_v13  ;;  %v1947_v22 = vadd.f32 %v1946_v19, %v1945_v17 }
 0x10d   :  { %v1884_v23 = vpop.f32.mrb[12].mxu0  ;;  %v2920_v24 = vadd.f32 %v1947_v22, %v680_v18 }
 0x10e   :  { %v1885_v25 = vpop.f32.mrb[13].mxu0 }
 0x10f   :  { %v1886_v26 = vadd.f32 %v1885_v25, %v1884_v23  ;;  %v1887_v27 = vpop.f32.mrb[14].mxu0  ;;  %v1948_v28 = vpop.f32.mrb[12].mxu1 }
 0x110   :  { %v1888_v29 = vpop.f32.mrb[15].mxu0  ;;  %v1949_v32 = vpop.f32.mrb[13].mxu1 }
 0x111   :  { %v685_v30 = vadd.f32 %v1886_v26, %v2884_v34  ;;  %v1889_v31 = vadd.f32 %v1888_v29, %v1887_v27  ;;  %v1950_v33 = vadd.f32 %v1949_v32, %v1948_v28  ;;  %v1951_v35 = vpop.f32.mrb[14].mxu1 }
 0x112   :  { %v1952_v37 = vpop.f32.mrb[15].mxu1 }
 0x113   :  { %v688_v36 = vadd.f32 %v1889_v31, %v2884_v34  ;;  %v2924_v38 = vadd.f32 %v1950_v33, %v685_v30  ;;  %v1953_v39 = vadd.f32 %v1952_v37, %v1951_v35 }
 0x115   :  { %v1890_v40 = vpop.f32.mrb[16].mxu0  ;;  %v2926_v41 = vadd.f32 %v1953_v39, %v688_v36 }
 0x116   :  { %v1891_v42 = vpop.f32.mrb[17].mxu0 }
 0x117   :  { %v1892_v43 = vadd.f32 %v1891_v42, %v1890_v40  ;;  %v1893_v44 = vpop.f32.mrb[18].mxu0  ;;  %v1954_v45 = vpop.f32.mrb[16].mxu1 }
 0x118   :  { %v1894_v46 = vpop.f32.mrb[19].mxu0  ;;  %v1955_v50 = vpop.f32.mrb[17].mxu1 }
 0x119   :  { %v693_v47 = vadd.f32 %v1892_v43, %v2884_v34  ;;  %v1895_v48 = vadd.f32 %v1894_v46, %v1893_v44  ;;  %v1956_v51 = vadd.f32 %v1955_v50, %v1954_v45  ;;  %v1957_v53 = vpop.f32.mrb[18].mxu1 }
 0x11a   :  { %v1958_v55 = vpop.f32.mrb[19].mxu1 }
 0x11b   :  { %v696_v54 = vadd.f32 %v1895_v48, %v2884_v34  ;;  %v2930_v56 = vadd.f32 %v1956_v51, %v693_v47  ;;  %v1959_v57 = vadd.f32 %v1958_v55, %v1957_v53 }
 0x11d   :  { %v1896_v58 = vpop.f32.mrb[20].mxu0  ;;  %v2932_v59 = vadd.f32 %v1959_v57, %v696_v54 }
 0x11e   :  { %v1897_v60 = vpop.f32.mrb[21].mxu0 }
 0x11f   :  { %v1898_v61 = vadd.f32 %v1897_v60, %v1896_v58  ;;  %v1899_v62 = vpop.f32.mrb[22].mxu0  ;;  %v1960_v63 = vpop.f32.mrb[20].mxu1 }
 0x120   :  { %v1900_v0 = vpop.f32.mrb[23].mxu0  ;;  %v1961_v4 = vpop.f32.mrb[21].mxu1 }
 0x121   :  { %v701_v1 = vadd.f32 %v1898_v61, %v2884_v34  ;;  %v1901_v2 = vadd.f32 %v1900_v0, %v1899_v62  ;;  %v1962_v5 = vadd.f32 %v1961_v4, %v1960_v63  ;;  %v1963_v7 = vpop.f32.mrb[22].mxu1 }
 0x122   :  { %v1964_v9 = vpop.f32.mrb[23].mxu1 }
 0x123   :  { %v704_v8 = vadd.f32 %v1901_v2, %v2884_v34  ;;  %v2936_v10 = vadd.f32 %v1962_v5, %v701_v1  ;;  %v1965_v11 = vadd.f32 %v1964_v9, %v1963_v7 }
 0x125   :  { %v1902_v12 = vpop.f32.mrb[24].mxu0  ;;  %v2938_v13 = vadd.f32 %v1965_v11, %v704_v8 }
 0x126   :  { %v1903_v14 = vpop.f32.mrb[25].mxu0 }
 0x127   :  { %v1904_v15 = vadd.f32 %v1903_v14, %v1902_v12  ;;  %v1905_v16 = vpop.f32.mrb[26].mxu0  ;;  %v1966_v17 = vpop.f32.mrb[24].mxu1 }
 0x128   :  { %v1906_v18 = vpop.f32.mrb[27].mxu0  ;;  %v1967_v22 = vpop.f32.mrb[25].mxu1 }
 0x129   :  { %v709_v19 = vadd.f32 %v1904_v15, %v2884_v34  ;;  %v1907_v20 = vadd.f32 %v1906_v18, %v1905_v16  ;;  %v1968_v23 = vadd.f32 %v1967_v22, %v1966_v17  ;;  %v1969_v25 = vpop.f32.mrb[26].mxu1 }
 0x12a   :  { %v1970_v27 = vpop.f32.mrb[27].mxu1 }
 0x12b   :  { %v712_v26 = vadd.f32 %v1907_v20, %v2884_v34  ;;  %v2942_v28 = vadd.f32 %v1968_v23, %v709_v19  ;;  %v1971_v29 = vadd.f32 %v1970_v27, %v1969_v25 }
 0x12d   :  { %v1908_v30 = vpop.f32.mrb[28].mxu0  ;;  %v2944_v31 = vadd.f32 %v1971_v29, %v712_v26 }
 0x12e   :  { %v1909_v32 = vpop.f32.mrb[29].mxu0 }
 0x12f   :  { %v1910_v33 = vadd.f32 %v1909_v32, %v1908_v30  ;;  %v1911_v35 = vpop.f32.mrb[30].mxu0  ;;  %v1972_v36 = vpop.f32.mrb[28].mxu1 }
 0x130   :  { %v1912_v37 = vpop.f32.mrb[31].mxu0  ;;  %v1973_v42 = vpop.f32.mrb[29].mxu1 }
 0x131   :  { %v717_v39 = vadd.f32 %v1910_v33, %v2884_v34  ;;  %v1913_v40 = vadd.f32 %v1912_v37, %v1911_v35  ;;  %v1974_v43 = vadd.f32 %v1973_v42, %v1972_v36  ;;  %v1975_v44 = vpop.f32.mrb[30].mxu1 }
 0x132   :  { %v1976_v46 = vpop.f32.mrb[31].mxu1 }
 0x133   :  { %v720_v45 = vadd.f32 %v1913_v40, %v2884_v34  ;;  %v2948_v47 = vadd.f32 %v1974_v43, %v717_v39  ;;  %v1977_v48 = vadd.f32 %v1976_v46, %v1975_v44 }
 0x135   :  { %v1994_v50 = vpop.f32.mrb[32].mxu0  ;;  %v2950_v51 = vadd.f32 %v1977_v48, %v720_v45 }
 0x136   :  { %v1995_v53 = vpop.f32.mrb[33].mxu0 }
 0x137   :  { %v1996_v54 = vadd.f32 %v1995_v53, %v1994_v50  ;;  %v1997_v55 = vpop.f32.mrb[34].mxu0  ;;  %v2103_v58 = vpop.f32.mrb[32].mxu1 }
 0x138   :  { %v1998_v57 = vpop.f32.mrb[35].mxu0  ;;  %v951_v62 = vpop.f32.mrb[33].mxu1 }
 0x139   :  { %v1999_v60 = vadd.f32 %v1998_v57, %v1997_v55  ;;  %v855_v61 = vadd.f32 %v1996_v54, %v2894_v49  ;;  %v2104_v63 = vpop.f32.mrb[34].mxu1 }
 0x13a   :  { %v954_v1 = vpop.f32.mrb[35].mxu1 }
 0x13b   :  { %v952_v0 = vadd.f32 %v951_v62, %v855_v61  ;;  %v858_v34 = vadd.f32 %v1999_v60, %v2896_v52 }
 0x13d   :  { %v955_v2 = vadd.f32 %v954_v1, %v858_v34  ;;  %v2000_v4 = vpop.f32.mrb[36].mxu0  ;;  %v1014_v7 = vmax.f32 %v952_v0, 0.0 }
 0x13e   :  { %v2001_v5 = vpop.f32.mrb[37].mxu0 }
 0x13f   :  { %v1015_v8 = vmax.f32 %v955_v2, 0.0  ;;  %v2002_v9 = vadd.f32 %v2001_v5, %v2000_v4  ;;  %v2003_v11 = vpop.f32.mrb[38].mxu0  ;;  %v2107_v14 = vpop.f32.mrb[36].mxu1 }
 0x140   :  { %v2004_v12 = vpop.f32.mrb[39].mxu0  ;;  %v967_v49 = vpop.f32.mrb[37].mxu1 }
 0x141   :  { %v1030_v15 = vpack.c.bf16 %v1015_v8, %v1014_v7  ;;  %v863_v16 = vadd.f32 %v2002_v9, %v2906_v3  ;;  %v2005_v17 = vadd.f32 %v2004_v12, %v2003_v11  ;;  %v2108_v18 = vpop.f32.mrb[38].mxu1 }
 0x142   :  { %v970_v52 = vpop.f32.mrb[39].mxu1 }
 0x143   :  { %v960_v19 = vadd.f32 %v2103_v58, %v863_v16  ;;  %v866_v20 = vadd.f32 %v2005_v17, %v2908_v6  ;;  %2133 = vmatprep.mubr.bf16.mxu1 %v1030_v15 }
 0x145   :  { %v963_v22 = vadd.f32 %v2104_v63, %v866_v20  ;;  %v2006_v23 = vpop.f32.mrb[40].mxu0  ;;  %v1016_v26 = vmax.f32 %v960_v19, 0.0 }
 0x146   :  { %v2007_v25 = vpop.f32.mrb[41].mxu0 }
 0x147   :  { %v1017_v27 = vmax.f32 %v963_v22, 0.0  ;;  %v2008_v29 = vadd.f32 %v2007_v25, %v2006_v23  ;;  %v2009_v30 = vpop.f32.mrb[42].mxu0  ;;  %v2111_v33 = vpop.f32.mrb[40].mxu1 }
 0x148   :  { %v2010_v32 = vpop.f32.mrb[43].mxu0  ;;  %v983_v37 = vpop.f32.mrb[41].mxu1 }
 0x149   :  { %v1031_v35 = vpack.c.bf16 %v1017_v27, %v1016_v26  ;;  %v2011_v36 = vadd.f32 %v2010_v32, %v2009_v30  ;;  %v871_v3 = vadd.f32 %v2008_v29, %v2918_v21  ;;  %v2112_v39 = vpop.f32.mrb[42].mxu1 }
 0x14a   :  { %v986_v42 = vpop.f32.mrb[43].mxu1 }
 0x14b   :  { %v968_v40 = vadd.f32 %v967_v49, %v871_v3  ;;  %2134 = vmatmul.mubr.bf16.vlgmr.msra.gmra.mrb[48].mxu1 %v1031_v35  ;;  %v874_v6 = vadd.f32 %v2011_v36, %v2920_v24 }
 0x14d   :  { %v971_v43 = vadd.f32 %v970_v52, %v874_v6  ;;  %v2012_v44 = vpop.f32.mrb[44].mxu0  ;;  %v1018_v46 = vmax.f32 %v968_v40, 0.0 }
 0x14e   :  { %v2013_v45 = vpop.f32.mrb[45].mxu0 }
 0x14f   :  { %v1019_v48 = vmax.f32 %v971_v43, 0.0  ;;  %v2014_v50 = vadd.f32 %v2013_v45, %v2012_v44  ;;  %v2015_v53 = vpop.f32.mrb[46].mxu0  ;;  %v2958_v55 = vpop.f32.mrb[44].mxu1 }
 0x150   :  { %v2016_v54 = vpop.f32.mrb[47].mxu0  ;;  %v999_v60 = vpop.f32.mrb[45].mxu1 }
 0x151   :  { %v1032_v57 = vpack.c.bf16 %v1019_v48, %v1018_v46  ;;  %v879_v21 = vadd.f32 %v2014_v50, %v2924_v38  ;;  %v2017_v58 = vadd.f32 %v2016_v54, %v2015_v53  ;;  %v2116_v61 = vpop.f32.mrb[46].mxu1 }
 0x152   :  { %v1002_v63 = vpop.f32.mrb[47].mxu1 }
 0x153   :  { %v976_v62 = vadd.f32 %v2107_v14, %v879_v21  ;;  %v882_v24 = vadd.f32 %v2017_v58, %v2926_v41  ;;  %2137 = vmatprep.mubr.bf16.mxu1 %v1032_v57 }
 0x155   :  { %v979_v0 = vadd.f32 %v2108_v18, %v882_v24  ;;  %v2018_v34 = vpop.f32.mrb[48].mxu0  ;;  %v1020_v2 = vmax.f32 %v976_v62, 0.0  ;;  %v2284_v62 = vld [vmem:[%s3029_s7 + $0x18] sm:$0xff]   ;;  %v2285_v24 = vld [vmem:[%s3029_s7 + $0x20] sm:$0xff]  }
 0x156   :  { %v2019_v1 = vpop.f32.mrb[49].mxu0 }
 0x157   :  { %v1021_v4 = vmax.f32 %v979_v0, 0.0  ;;  %v2020_v5 = vadd.f32 %v2019_v1, %v2018_v34  ;;  %v2021_v7 = vpop.f32.mrb[50].mxu0  ;;  %v1744_v0 = vld [vmem:[%s3026_s4] ss:$0 sm:$0xff] }
 0x158   :  { %v2022_v8 = vpop.f32.mrb[51].mxu0 }
 0x159   :  { %v2023_v9 = vadd.f32 %v2022_v8, %v2021_v7  ;;  %v887_v11 = vadd.f32 %v2020_v5, %v2930_v56  ;;  %v1033_v38 = vpack.c.bf16 %v1021_v4, %v1020_v2 }
 0x15b   :  { %v984_v12 = vadd.f32 %v983_v37, %v887_v11  ;;  %2138 = vmatmul.mubr.bf16.gmra.mrb[52].mxu1 %v1033_v38  ;;  %v890_v14 = vadd.f32 %v2023_v9, %v2932_v59 }
 0x15d   :  { %v987_v15 = vadd.f32 %v986_v42, %v890_v14  ;;  %v2024_v41 = vpop.f32.mrb[52].mxu0  ;;  %v1022_v17 = vmax.f32 %v984_v12, 0.0 }
 0x15e   :  { %v2025_v16 = vpop.f32.mrb[53].mxu0 }
 0x15f   :  { %v1023_v49 = vmax.f32 %v987_v15, 0.0  ;;  %v2026_v18 = vadd.f32 %v2025_v16, %v2024_v41  ;;  %v2027_v19 = vpop.f32.mrb[54].mxu0 }
 0x160   :  { %v2028_v20 = vpop.f32.mrb[55].mxu0 }
 0x161   :  { %v1034_v52 = vpack.c.bf16 %v1023_v49, %v1022_v17  ;;  %v895_v22 = vadd.f32 %v2026_v18, %v2936_v10  ;;  %v2029_v23 = vadd.f32 %v2028_v20, %v2027_v19 }
 0x163   :  { %v992_v25 = vadd.f32 %v2111_v33, %v895_v22  ;;  %v898_v56 = vadd.f32 %v2029_v23, %v2938_v13  ;;  %2141 = vmatprep.mubr.bf16.mxu1 %v1034_v52 }
 0x165   :  { %v995_v26 = vadd.f32 %v2112_v39, %v898_v56  ;;  %v2030_v27 = vpop.f32.mrb[56].mxu0  ;;  %v1024_v59 = vmax.f32 %v992_v25, 0.0 }
 0x166   :  { %v2031_v29 = vpop.f32.mrb[57].mxu0 }
 0x167   :  { %v1025_v30 = vmax.f32 %v995_v26, 0.0  ;;  %v2032_v32 = vadd.f32 %v2031_v29, %v2030_v27  ;;  %v2033_v35 = vpop.f32.mrb[58].mxu0 }
 0x168   :  { %v2034_v36 = vpop.f32.mrb[59].mxu0 }
 0x169   :  { %v2035_v3 = vadd.f32 %v2034_v36, %v2033_v35  ;;  %v903_v37 = vadd.f32 %v2032_v32, %v2942_v28  ;;  %v1035_v40 = vpack.c.bf16 %v1025_v30, %v1024_v59 }
 0x16b   :  { %v1000_v6 = vadd.f32 %v999_v60, %v903_v37  ;;  %2142 = vmatmul.mubr.bf16.gmra.mrb[56].mxu1 %v1035_v40  ;;  %v906_v10 = vadd.f32 %v2035_v3, %v2944_v31  ;;  %v2279_v60 = vld [vmem:[%s3027_s5 + $0x30] sm:$0xff]  }
 0x16c   :  { %2161 = vmatprep.subr.bf16.mxu0 %v2279_v60 }
 0x16d   :  { %v1003_v33 = vadd.f32 %v1002_v63, %v906_v10  ;;  %v2036_v42 = vpop.f32.mrb[60].mxu0  ;;  %v1026_v43 = vmax.f32 %v1000_v6, 0.0  ;;  %2162 = vmatpush3.bf16.msra.mxu0 %v2279_v60  ;;  %v2286_v63 = vld [vmem:[%s3029_s7 + $0x28] sm:$0xff]  }
 0x16e   :  { %v2037_v13 = vpop.f32.mrb[61].mxu0 }
 0x16f   :  { %v1027_v39 = vmax.f32 %v1003_v33, 0.0  ;;  %v2038_v44 = vadd.f32 %v2037_v13, %v2036_v42  ;;  %v2039_v45 = vpop.f32.mrb[62].mxu0 }
 0x170   :  { %v2040_v46 = vpop.f32.mrb[63].mxu0 }
 0x171   :  { %v1036_v48 = vpack.c.bf16 %v1027_v39, %v1026_v43  ;;  %v911_v50 = vadd.f32 %v2038_v44, %v2948_v47  ;;  %v2041_v53 = vadd.f32 %v2040_v46, %v2039_v45  ;;  %v2280_v47 = vld [vmem:[%s3027_s5 + $0x38] sm:$0xff]  }
 0x172   :  { %2163 = vmatprep.subr.bf16.mxu0 %v2280_v47 }
 0x173   :  { %v1008_v54 = vadd.f32 %v2958_v55, %v911_v50  ;;  %v914_v28 = vadd.f32 %v2041_v53, %v2950_v51  ;;  %2145 = vmatprep.mubr.bf16.mxu1 %v1036_v48  ;;  %2164 = vmatpush3.bf16.msra.mxu0 %v2280_v47  ;;  %v2281_v51 = vld [vmem:[%s3029_s7] sm:$0xff]   ;;  %v2282_v55 = vld [vmem:[%s3029_s7 + $0x8] sm:$0xff]   ;;  %v2287_v47 = vld [vmem:[%s3029_s7 + $0x30] sm:$0xff]  }
 0x174   :  { %2181 = vmatprep.subr.bf16.mxu1 %v2281_v51 }
 0x175   :  { %v1011_v57 = vadd.f32 %v2116_v61, %v914_v28  ;;  %v1028_v21 = vmax.f32 %v1008_v54, 0.0  ;;  %2182 = vmatpush3.bf16.msra.mxu1 %v2281_v51  ;;  %v2283_v61 = vld [vmem:[%s3029_s7 + $0x10] sm:$0xff]   ;;  %v2288_v51 = vld [vmem:[%s3029_s7 + $0x38] sm:$0xff]  }
 0x176   :  { %2183 = vmatprep.subr.bf16.mxu1 %v2282_v55 }
 0x177   :  { %v1029_v31 = vmax.f32 %v1011_v57, 0.0 }
 0x179   :  { %v1037_v58 = vpack.c.bf16 %v1029_v31, %v1028_v21  ;;  %2184 = vmatpush3.bf16.msra.mxu1 %v2282_v55  ;;  %v1753_v55 = vld [vmem:[%s3028_s6] ss:$0 sm:$0xff] }
 0x17a   :  { %2185 = vmatprep.subr.bf16.mxu1 %v2283_v61 }
 0x17b   :  { %2146 = vmatmul.mubr.bf16.gmra.mrb[60].mxu1 %v1037_v58 }
 0x17d   :  { %2186 = vmatpush3.bf16.msra.mxu1 %v2283_v61 }
 0x17e   :  { %2187 = vmatprep.subr.bf16.mxu1 %v2284_v62 }
 0x181   :  { %2188 = vmatpush3.bf16.msra.mxu1 %v2284_v62 }
 0x182   :  { %2189 = vmatprep.subr.bf16.mxu1 %v2285_v24 }
 0x185   :  { %2190 = vmatpush3.bf16.msra.mxu1 %v2285_v24 }
 0x186   :  { %2191 = vmatprep.subr.bf16.mxu1 %v2286_v63 }
 0x189   :  { %2192 = vmatpush3.bf16.msra.mxu1 %v2286_v63 }
 0x18a   :  { %2193 = vmatprep.subr.bf16.mxu1 %v2287_v47 }
 0x18d   :  { %2194 = vmatpush3.bf16.msra.mxu1 %v2287_v47 }
 0x18e   :  { %2195 = vmatprep.subr.bf16.mxu1 %v2288_v51 }
 0x191   :  { %2196 = vmatpush3.bf16.msra.mxu1 %v2288_v51 }
 0x21e   :  { %v2135_v34 = vpop.f32.mrb[48].mxu1 }
 0x21f   :  { %v1152_v1 = vadd.f32 %v2135_v34, %v1744_v0  ;;  %v1143_v2 = vpop.f32.mrb[49].mxu1 }
 0x220   :  { %v1144_v4 = vadd.f32 %v1744_v0, %v1143_v2  ;;  %v2136_v5 = vpop.f32.mrb[50].mxu1 }
 0x221   :  { %v1155_v7 = vadd.f32 %v2136_v5, %v1744_v0  ;;  %v1146_v8 = vpop.f32.mrb[51].mxu1  ;;  %v1208_v11 = vmax.f32 %v1152_v1, 0.0 }
 0x222   :  { %v1147_v9 = vadd.f32 %v1744_v0, %v1146_v8  ;;  %v1206_v12 = vmax.f32 %v1144_v4, 0.0 }
 0x223   :  { %v1209_v38 = vmax.f32 %v1155_v7, 0.0 }
 0x224   :  { %v1207_v14 = vmax.f32 %v1147_v9, 0.0 }
 0x225   :  { %v1223_v15 = vpack.c.bf16 %v1209_v38, %v1208_v11 }
 0x226   :  { %v1222_v41 = vpack.c.bf16 %v1207_v14, %v1206_v12 }
 0x228   :  { %2165 = vmatprep.mubr.bf16.mxu0 %v1222_v41 }
 0x229   :  { %2166 = vmatmul.mubr.bf16.vlgmr.msra.gmra.mrb[64].mxu0 %v1223_v15 }
 0x22e   :  { %v2139_v16 = vpop.f32.mrb[52].mxu1 }
 0x22f   :  { %v1168_v17 = vadd.f32 %v2139_v16, %v1744_v0  ;;  %v1159_v49 = vpop.f32.mrb[53].mxu1 }
 0x230   :  { %v1160_v18 = vadd.f32 %v1744_v0, %v1159_v49  ;;  %v2140_v19 = vpop.f32.mrb[54].mxu1 }
 0x231   :  { %v1171_v20 = vadd.f32 %v2140_v19, %v1744_v0  ;;  %v1162_v52 = vpop.f32.mrb[55].mxu1  ;;  %v1212_v23 = vmax.f32 %v1168_v17, 0.0 }
 0x232   :  { %v1163_v22 = vadd.f32 %v1744_v0, %v1162_v52  ;;  %v1210_v56 = vmax.f32 %v1160_v18, 0.0 }
 0x233   :  { %v1213_v25 = vmax.f32 %v1171_v20, 0.0 }
 0x234   :  { %v1211_v26 = vmax.f32 %v1163_v22, 0.0 }
 0x235   :  { %v1225_v27 = vpack.c.bf16 %v1213_v25, %v1212_v23 }
 0x236   :  { %v1224_v29 = vpack.c.bf16 %v1211_v26, %v1210_v56 }
 0x238   :  { %2169 = vmatprep.mubr.bf16.mxu0 %v1224_v29 }
 0x239   :  { %2170 = vmatmul.mubr.bf16.gmra.mrb[68].mxu0 %v1225_v27 }
 0x23e   :  { %v2143_v59 = vpop.f32.mrb[56].mxu1 }
 0x23f   :  { %v1184_v30 = vadd.f32 %v2143_v59, %v1744_v0  ;;  %v1175_v32 = vpop.f32.mrb[57].mxu1 }
 0x240   :  { %v1176_v35 = vadd.f32 %v1744_v0, %v1175_v32  ;;  %v2144_v36 = vpop.f32.mrb[58].mxu1 }
 0x241   :  { %v1187_v3 = vadd.f32 %v2144_v36, %v1744_v0  ;;  %v1178_v37 = vpop.f32.mrb[59].mxu1  ;;  %v1216_v6 = vmax.f32 %v1184_v30, 0.0 }
 0x242   :  { %v1179_v40 = vadd.f32 %v1744_v0, %v1178_v37  ;;  %v1214_v33 = vmax.f32 %v1176_v35, 0.0 }
 0x243   :  { %v1217_v10 = vmax.f32 %v1187_v3, 0.0 }
 0x244   :  { %v1215_v42 = vmax.f32 %v1179_v40, 0.0 }
 0x245   :  { %v1227_v13 = vpack.c.bf16 %v1217_v10, %v1216_v6 }
 0x246   :  { %v1226_v43 = vpack.c.bf16 %v1215_v42, %v1214_v33 }
 0x248   :  { %2173 = vmatprep.mubr.bf16.mxu0 %v1226_v43 }
 0x249   :  { %2174 = vmatmul.mubr.bf16.gmra.mrb[72].mxu0 %v1227_v13 }
 0x24e   :  { %v2147_v39 = vpop.f32.mrb[60].mxu1 }
 0x24f   :  { %v1200_v44 = vadd.f32 %v2147_v39, %v1744_v0  ;;  %v1191_v45 = vpop.f32.mrb[61].mxu1 }
 0x250   :  { %v1192_v46 = vadd.f32 %v1744_v0, %v1191_v45  ;;  %v2148_v48 = vpop.f32.mrb[62].mxu1 }
 0x251   :  { %v1203_v50 = vadd.f32 %v2148_v48, %v1744_v0  ;;  %v1194_v53 = vpop.f32.mrb[63].mxu1  ;;  %v1220_v28 = vmax.f32 %v1200_v44, 0.0 }
 0x252   :  { %v1195_v54 = vadd.f32 %v1744_v0, %v1194_v53  ;;  %v1218_v21 = vmax.f32 %v1192_v46, 0.0 }
 0x253   :  { %v1221_v57 = vmax.f32 %v1203_v50, 0.0 }
 0x254   :  { %v1219_v31 = vmax.f32 %v1195_v54, 0.0 }
 0x255   :  { %v1229_v58 = vpack.c.bf16 %v1221_v57, %v1220_v28 }
 0x256   :  { %v1228_v60 = vpack.c.bf16 %v1219_v31, %v1218_v21  ;;  %v1762_v21 = vld [vmem:[%s3030_s8] ss:$0 sm:$0xff]  ;;  %s2313_s8 = smov [#allocation2]  }
 0x257   :  { %s1675_s12 = sshll.u32 %s2313_s8, 4  ;;  %s1676_s12 = int_to_ptr.vmem [resolvable:$true] %s1675_s12 }
 0x258   :  { %2177 = vmatprep.mubr.bf16.mxu0 %v1228_v60  ;;  %s2289_s13 = scalar_lea.vmem %s1676_s12, 1024  ;;  %p2294_p1 = scmp.lt.s32.totalorder %s1676_s12, %s1676_s12 }
 0x259   :  { %2178 = vmatmul.mubr.bf16.gmra.mrb[76].mxu0 %v1229_v58  ;;  %p2290_p0 = scmp.ne.s32.totalorder %s1676_s12, %s2289_s13  ;;  %p2295_p2 = scmp.lt.s32.totalorder %s2289_s13, %s2289_s13 }
 0x25b   :  { %p2296_p3 = por %p2295_p2, %p2294_p1 }
 0x25d   :  { %p2297_p4 = pnand %p2296_p3, %p2290_p0 }
 0x2fc   :  { %v2167_v61 = vpop.f32.mrb[64].mxu0 }
 0x2fd   :  { %v1344_v62 = vadd.f32 %v2167_v61, %v1753_v55  ;;  %v1335_v24 = vpop.f32.mrb[65].mxu0 }
 0x2fe   :  { %v1336_v63 = vadd.f32 %v1753_v55, %v1335_v24  ;;  %v2168_v0 = vpop.f32.mrb[66].mxu0 }
 0x2ff   :  { %v1347_v34 = vadd.f32 %v2168_v0, %v1753_v55  ;;  %v1338_v1 = vpop.f32.mrb[67].mxu0  ;;  %v1400_v4 = vmax.f32 %v1344_v62, 0.0 }
 0x300   :  { %v1339_v2 = vadd.f32 %v1753_v55, %v1338_v1  ;;  %v1398_v7 = vmax.f32 %v1336_v63, 0.0 }
 0x301   :  { %v1401_v5 = vmax.f32 %v1347_v34, 0.0 }
 0x302   :  { %v1399_v8 = vmax.f32 %v1339_v2, 0.0 }
 0x303   :  { %v1415_v9 = vpack.c.bf16 %v1401_v5, %v1400_v4 }
 0x304   :  { %v1414_v11 = vpack.c.bf16 %v1399_v8, %v1398_v7 }
 0x306   :  { %2197 = vmatprep.mubr.bf16.mxu1 %v1414_v11 }
 0x307   :  { %2198 = vmatmul.mubr.bf16.vlgmr.msra.gmra.mrb[64].mxu1 %v1415_v9 }
 0x30c   :  { %v2171_v38 = vpop.f32.mrb[68].mxu0 }
 0x30d   :  { %v1360_v12 = vadd.f32 %v2171_v38, %v1753_v55  ;;  %v1351_v14 = vpop.f32.mrb[69].mxu0 }
 0x30e   :  { %v1352_v15 = vadd.f32 %v1753_v55, %v1351_v14  ;;  %v2172_v41 = vpop.f32.mrb[70].mxu0 }
 0x30f   :  { %v1363_v16 = vadd.f32 %v2172_v41, %v1753_v55  ;;  %v1354_v17 = vpop.f32.mrb[71].mxu0  ;;  %v1404_v18 = vmax.f32 %v1360_v12, 0.0 }
 0x310   :  { %v1355_v49 = vadd.f32 %v1753_v55, %v1354_v17  ;;  %v1402_v20 = vmax.f32 %v1352_v15, 0.0 }
 0x311   :  { %v1405_v19 = vmax.f32 %v1363_v16, 0.0 }
 0x312   :  { %v1403_v52 = vmax.f32 %v1355_v49, 0.0 }
 0x313   :  { %v1417_v22 = vpack.c.bf16 %v1405_v19, %v1404_v18 }
 0x314   :  { %v1416_v23 = vpack.c.bf16 %v1403_v52, %v1402_v20 }
 0x316   :  { %2201 = vmatprep.mubr.bf16.mxu1 %v1416_v23 }
 0x317   :  { %2202 = vmatmul.mubr.bf16.gmra.mrb[68].mxu1 %v1417_v22 }
 0x31c   :  { %v2175_v25 = vpop.f32.mrb[72].mxu0 }
 0x31d   :  { %v1376_v56 = vadd.f32 %v2175_v25, %v1753_v55  ;;  %v1367_v26 = vpop.f32.mrb[73].mxu0 }
 0x31e   :  { %v1368_v27 = vadd.f32 %v1753_v55, %v1367_v26  ;;  %v2176_v29 = vpop.f32.mrb[74].mxu0 }
 0x31f   :  { %v1379_v59 = vadd.f32 %v2176_v29, %v1753_v55  ;;  %v1370_v30 = vpop.f32.mrb[75].mxu0  ;;  %v1408_v35 = vmax.f32 %v1376_v56, 0.0 }
 0x320   :  { %v1371_v32 = vadd.f32 %v1753_v55, %v1370_v30  ;;  %v1406_v3 = vmax.f32 %v1368_v27, 0.0 }
 0x321   :  { %v1409_v36 = vmax.f32 %v1379_v59, 0.0 }
 0x322   :  { %v1407_v37 = vmax.f32 %v1371_v32, 0.0 }
 0x323   :  { %v1419_v40 = vpack.c.bf16 %v1409_v36, %v1408_v35 }
 0x324   :  { %v1418_v6 = vpack.c.bf16 %v1407_v37, %v1406_v3 }
 0x326   :  { %2205 = vmatprep.mubr.bf16.mxu1 %v1418_v6 }
 0x327   :  { %2206 = vmatmul.mubr.bf16.gmra.mrb[72].mxu1 %v1419_v40 }
 0x32c   :  { %v2179_v10 = vpop.f32.mrb[76].mxu0 }
 0x32d   :  { %v1392_v33 = vadd.f32 %v2179_v10, %v1753_v55  ;;  %v1383_v42 = vpop.f32.mrb[77].mxu0 }
 0x32e   :  { %v1384_v13 = vadd.f32 %v1753_v55, %v1383_v42  ;;  %v2180_v43 = vpop.f32.mrb[78].mxu0 }
 0x32f   :  { %v1395_v39 = vadd.f32 %v2180_v43, %v1753_v55  ;;  %v1386_v44 = vpop.f32.mrb[79].mxu0  ;;  %v1412_v46 = vmax.f32 %v1392_v33, 0.0 }
 0x330   :  { %v1387_v45 = vadd.f32 %v1753_v55, %v1386_v44  ;;  %v1410_v50 = vmax.f32 %v1384_v13, 0.0 }
 0x331   :  { %v1413_v48 = vmax.f32 %v1395_v39, 0.0 }
 0x332   :  { %v1411_v53 = vmax.f32 %v1387_v45, 0.0 }
 0x333   :  { %v1421_v54 = vpack.c.bf16 %v1413_v48, %v1412_v46 }
 0x334   :  { %v1420_v28 = vpack.c.bf16 %v1411_v53, %v1410_v50 }
 0x336   :  { %2209 = vmatprep.mubr.bf16.mxu1 %v1420_v28 }
 0x337   :  { %2210 = vmatmul.mubr.bf16.gmra.mrb[76].mxu1 %v1421_v54 }
 0x3da   :  { %v2199_v57 = vpop.f32.mrb[64].mxu1 }
 0x3db   :  { %v1527_v31 = vpop.f32.mrb[65].mxu1  ;;  %v1536_v60 = vadd.f32 %v2199_v57, %v1762_v21 }
 0x3dc   :  { %v2200_v58 = vpop.f32.mrb[66].mxu1  ;;  %v1528_v61 = vadd.f32 %v1762_v21, %v1527_v31 }
 0x3dd   :  { %v1539_v47 = vadd.f32 %v2200_v58, %v1762_v21  ;;  %v1530_v51 = vpop.f32.mrb[67].mxu1 }
 0x3de   :  { %v1531_v55 = vadd.f32 %v1762_v21, %v1530_v51 }
 0x3df   :  { %v1811_v62 = vpack.c.bf16 %v1539_v47, %v1536_v60 }
 0x3e0   :  { %v1806_v24 = vpack.c.bf16 %v1531_v55, %v1528_v61 }
 0x3e1   :  { %1843 = vst [vmem:[#allocation2 + $0x8] sm:$0xff] %v1811_v62  }
 0x3e2   :  { %1807 = vst [vmem:[#allocation2] sm:$0xff] %v1806_v24  }
 0x3ea   :  { %v2203_v63 = vpop.f32.mrb[68].mxu1 }
 0x3eb   :  { %v1543_v0 = vpop.f32.mrb[69].mxu1  ;;  %v1552_v1 = vadd.f32 %v2203_v63, %v1762_v21 }
 0x3ec   :  { %v2204_v34 = vpop.f32.mrb[70].mxu1  ;;  %v1544_v5 = vadd.f32 %v1762_v21, %v1543_v0 }
 0x3ed   :  { %v1555_v2 = vadd.f32 %v2204_v34, %v1762_v21  ;;  %v1546_v4 = vpop.f32.mrb[71].mxu1 }
 0x3ee   :  { %v1547_v7 = vadd.f32 %v1762_v21, %v1546_v4 }
 0x3ef   :  { %v1821_v8 = vpack.c.bf16 %v1555_v2, %v1552_v1 }
 0x3f0   :  { %v1816_v9 = vpack.c.bf16 %v1547_v7, %v1544_v5 }
 0x3f1   :  { %1845 = vst [vmem:[#allocation2 + $0x18] sm:$0xff] %v1821_v8  }
 0x3f2   :  { %1844 = vst [vmem:[#allocation2 + $0x10] sm:$0xff] %v1816_v9  }
 0x3fa   :  { %v2207_v11 = vpop.f32.mrb[72].mxu1 }
 0x3fb   :  { %v1559_v38 = vpop.f32.mrb[73].mxu1  ;;  %v1568_v14 = vadd.f32 %v2207_v11, %v1762_v21 }
 0x3fc   :  { %v2208_v12 = vpop.f32.mrb[74].mxu1  ;;  %v1560_v16 = vadd.f32 %v1762_v21, %v1559_v38 }
 0x3fd   :  { %v1571_v15 = vadd.f32 %v2208_v12, %v1762_v21  ;;  %v1562_v41 = vpop.f32.mrb[75].mxu1 }
 0x3fe   :  { %v1563_v17 = vadd.f32 %v1762_v21, %v1562_v41 }
 0x3ff   :  { %v1831_v49 = vpack.c.bf16 %v1571_v15, %v1568_v14 }
 0x400   :  { %v1826_v18 = vpack.c.bf16 %v1563_v17, %v1560_v16 }
 0x401   :  { %1847 = vst [vmem:[#allocation2 + $0x28] sm:$0xff] %v1831_v49  }
 0x402   :  { %1846 = vst [vmem:[#allocation2 + $0x20] sm:$0xff] %v1826_v18  }
 0x40a   :  { %v2211_v19 = vpop.f32.mrb[76].mxu1 }
 0x40b   :  { %v1575_v20 = vpop.f32.mrb[77].mxu1  ;;  %v1584_v22 = vadd.f32 %v2211_v19, %v1762_v21 }
 0x40c   :  { %v2212_v52 = vpop.f32.mrb[78].mxu1  ;;  %v1576_v56 = vadd.f32 %v1762_v21, %v1575_v20 }
 0x40d   :  { %v1587_v23 = vadd.f32 %v2212_v52, %v1762_v21  ;;  %v1578_v25 = vpop.f32.mrb[79].mxu1 }
 0x40e   :  { %v1579_v26 = vadd.f32 %v1762_v21, %v1578_v25 }
 0x40f   :  { %v1841_v27 = vpack.c.bf16 %v1587_v23, %v1584_v22 }
 0x410   :  { %v1836_v29 = vpack.c.bf16 %v1579_v26, %v1576_v56 }
 0x411   :  { %1849 = vst [vmem:[#allocation2 + $0x38] sm:$0xff] %v1841_v27  }
 0x412   :  { %1848 = vst [vmem:[#allocation2 + $0x30] sm:$0xff] %v1836_v29  }
 0x413   :  { %2300 = shalt.err (!%p2297_p4)
}
 0x414   :  { %s2301_s0 = scalar_lea.hbm %s3031_s9, 1024 }
 0x415   :  { %p2302_p5 = scmp.ne.s32.totalorder %s3031_s9, %s2301_s0  ;;  %p2305_p6 = scmp.lt.u32.totalorder %s2301_s0, %s3031_s9 }
 0x417   :  { %p2307_p7 = pnand %p2305_p6, %p2302_p5 }
 0x419   :  { %2310 = shalt.err (!%p2307_p7)
}
 0x41a   :  { %s2314_s19 = smov 64   ;;  %s2315_s20 = smov 4  }
 0x41b   :  { %1681 = dma.vmem_to_hbm [thread:$0]  %s1676_s12, 1024, %s3031_s9, [#allocation3], %s2314_s19, %s2314_s19, %s2315_s20  }
 0x41c   :  { %2311 = dma.done.wait [#allocation3], 1024  }
 0x41d   :  { %2312 = vsyncadd [#allocation3], 4294966272 }
 0x41e   :  { %1685 = vsyncpa [#allocation3], 1 }

</bundles_post_ra>
